<compile_context>
chip_gen: v6e
topology: v6e:2x2x1
jax: 0.10.0
libtpu: 0.0.40
codegen_flags: <defaults>
</compile_context>

<pallas_src>
import functools

import jax
import jax.numpy as jnp
from jax.experimental import pallas as pl
from jax.experimental.pallas import tpu as pltpu


def _lstm_fc_kernel(x_ref, h0_ref, c0_ref, wih_ref, whh_ref, b_ref,
                    wfc_ref, bfc_ref, out_ref, hn_ref, cn_ref, *,
                    seq_len, mxu_dtype):
    bb, H = h0_ref.shape                       # batch tile, hidden size
    D = x_ref.shape[1]                         # input size (x_ref is (bb*T, D))

    # ---- Bulk input projection (off the serial h->h chain) -----------------
    # gates_x[b, t] = x[b, t] @ W_ih^T + (b_ih + b_hh), for ALL timesteps, in
    # one MXU matmul.
    x_flat = x_ref[...].astype(mxu_dtype)                             # (bb*T, D)
    xw = jnp.dot(x_flat, wih_ref[...],
                 preferred_element_type=jnp.float32) + b_ref[...]     # (bb*T, 4H)
    xw = xw.reshape(bb, seq_len, 4 * H)        # split leading dim; lane dim kept

    whh = whh_ref[...]                         # (H, 4H) — hoisted out of the loop

    h = h0_ref[...].astype(jnp.float32)
    c = c0_ref[...].astype(jnp.float32)

    # ---- Fully-unrolled recurrence (T is static & small) -------------------
    # Per step: one (bb, H) x (H, 4H) matmul + 3 full-width EUP passes.
    # TODO(synk): for long T, stage xw in a VMEM scratch and switch to
    # lax.fori_loop(..., unroll=4/8) / chunk T over an 'arbitrary' grid axis to
    # bound vreg pressure, code size, and the whole-sequence VMEM footprint
    # (v7x has only 64 MiB physical VMEM).
    for t in range(seq_len):
        gates = xw[:, t, :] + jnp.dot(h.astype(mxu_dtype), whh,
                                      preferred_element_type=jnp.float32)
        sig = jax.nn.sigmoid(gates)            # one full-width sigmoid pass
        th = jnp.tanh(gates)                   # one full-width tanh pass
        i_g = sig[:, 0 * H:1 * H]
        f_g = sig[:, 1 * H:2 * H]
        g_g = th[:, 2 * H:3 * H]
        o_g = sig[:, 3 * H:4 * H]
        c = f_g * c + i_g * g_g
        h = o_g * jnp.tanh(c)

    # ---- Fused fully-connected head on the last hidden state ---------------
    out = jnp.dot(h.astype(mxu_dtype), wfc_ref[...],
                  preferred_element_type=jnp.float32) + bfc_ref[...]
    out_ref[...] = out.astype(out_ref.dtype)
    hn_ref[...] = h.astype(hn_ref.dtype)
    cn_ref[...] = c.astype(cn_ref.dtype)


def music_rnn_forward(x, hidden, params, *, batch_block=None,
                      use_bf16_matmul=False):
    """x: (B, T, input_size) float32 (batch_first); hidden: (h0, c0), each
    (1, B, H).  Returns (out, (h_n, c_n)) with out: (B, output_size),
    h_n/c_n: (1, B, H), matching the PyTorch module.
    """
    h0, c0 = hidden
    B, T, D = x.shape
    H = params["w_hh"].shape[1]                # w_hh: (4H, H)
    O = params["w_fc"].shape[0]                # w_fc: (O, H)

    # Pad the batch to a multiple of 8 (f32 sublane) — fills vreg sublanes /
    # MXU rows and keeps BlockSpec second-to-last dims aligned.
    B_pad = ((max(B, 8) + 7) // 8) * 8
    pad = B_pad - B

    h0_2d, c0_2d = h0[0], c0[0]                # (B, H)
    xp = x
    if pad:
        xp = jnp.pad(x, ((0, pad), (0, 0), (0, 0)))
        h0_2d = jnp.pad(h0_2d, ((0, pad), (0, 0)))
        c0_2d = jnp.pad(c0_2d, ((0, pad), (0, 0)))

    if batch_block is None:
        bb = B_pad        # single tile: best on 1-TC chips (v5e/v6e)
        # TODO(synk): on v7x pass batch_block = B_pad // 2 (multiple of 8) when
        # B_pad >= 16 so the "parallel" grid axis shards across both TensorCores.
    else:
        bb = batch_block
    assert bb % 8 == 0, "batch_block must be a multiple of 8 (f32 sublane)"
    assert B_pad % bb == 0, "batch_block must divide the padded batch"

    mxu_dtype = jnp.bfloat16 if use_bf16_matmul else jnp.float32

    # Weight prep: split projections (x-path leaves the recurrent loop),
    # pre-summed biases, MXU-operand dtype cast.
    wih_t = params["w_ih"].T.astype(mxu_dtype)                      # (D, 4H)
    whh_t = params["w_hh"].T.astype(mxu_dtype)                      # (H, 4H)
    bias = (params["b_ih"] + params["b_hh"]).reshape(1, 4 * H).astype(jnp.float32)
    wfc_t = params["w_fc"].T.astype(mxu_dtype)                      # (H, O)
    bfc = params["b_fc"].reshape(1, O).astype(jnp.float32)

    # Flatten x to (B_pad*T, D), batch-major: batch tile i owns the contiguous
    # row range [i*bb*T, (i+1)*bb*T), so a plain 2D BlockSpec covers it and the
    # kernel's bulk matmul needs no merge-reshape of a sub-128-lane block.
    x_flat = xp.reshape(B_pad * T, D)

    batch_tile = lambda i: (i, 0)
    replicated = lambda i: (0, 0)

    kernel = functools.partial(_lstm_fc_kernel, seq_len=T, mxu_dtype=mxu_dtype)

    out, h_n, c_n = pl.pallas_call(
        kernel,
        out_shape=(
            jax.ShapeDtypeStruct((B_pad, O), x.dtype),
            jax.ShapeDtypeStruct((B_pad, H), x.dtype),
            jax.ShapeDtypeStruct((B_pad, H), x.dtype),
        ),
        grid=(B_pad // bb,),                            # batch-parallel axis
        in_specs=[
            pl.BlockSpec((bb * T, D), batch_tile),      # x, (b,t)-major flat
            pl.BlockSpec((bb, H), batch_tile),          # h0
            pl.BlockSpec((bb, H), batch_tile),          # c0
            pl.BlockSpec((D, 4 * H), replicated),       # W_ih^T
            pl.BlockSpec((H, 4 * H), replicated),       # W_hh^T
            pl.BlockSpec((1, 4 * H), replicated),       # b_ih + b_hh
            pl.BlockSpec((H, O), replicated),           # W_fc^T
            pl.BlockSpec((1, O), replicated),           # b_fc
        ],
        out_specs=[
            pl.BlockSpec((bb, O), batch_tile),
            pl.BlockSpec((bb, H), batch_tile),
            pl.BlockSpec((bb, H), batch_tile),
        ],
        compiler_params=pltpu.CompilerParams(
            dimension_semantics=("parallel",)),         # batch tiles independent
    )(x_flat, h0_2d, c0_2d, wih_t, whh_t, bias, wfc_t, bfc)

    if pad:
        out, h_n, c_n = out[:B], h_n[:B], c_n[:B]
    return out, (h_n[None], c_n[None])


def _reference_forward(x, hidden, params):
    """Pure-JAX reference matching nn.LSTM (1 layer, batch_first) + nn.Linear."""
    h = hidden[0][0]
    c = hidden[1][0]
    H = params["w_hh"].shape[1]
    wih_t, whh_t = params["w_ih"].T, params["w_hh"].T
    b = params["b_ih"] + params["b_hh"]
    for t in range(x.shape[1]):
        gates = x[:, t, :] @ wih_t + h @ whh_t + b
        i = jax.nn.sigmoid(gates[:, 0 * H:1 * H])
        f = jax.nn.sigmoid(gates[:, 1 * H:2 * H])
        g = jnp.tanh(gates[:, 2 * H:3 * H])
        o = jax.nn.sigmoid(gates[:, 3 * H:4 * H])
        c = f * c + i * g
        h = o * jnp.tanh(c)
    out = h @ params["w_fc"].T + params["b_fc"]
    return out, (h[None], c[None])


def init_params(key, input_size, hidden_size, output_size):
    ks = jax.random.split(key, 6)
    s = 1.0 / jnp.sqrt(hidden_size)
    return {
        "w_ih": jax.random.uniform(ks[0], (4 * hidden_size, input_size),
                                   jnp.float32, -s, s),
        "w_hh": jax.random.uniform(ks[1], (4 * hidden_size, hidden_size),
                                   jnp.float32, -s, s),
        "b_ih": jax.random.uniform(ks[2], (4 * hidden_size,), jnp.float32, -s, s),
        "b_hh": jax.random.uniform(ks[3], (4 * hidden_size,), jnp.float32, -s, s),
        "w_fc": jax.random.uniform(ks[4], (output_size, hidden_size),
                                   jnp.float32, -s, s),
        "b_fc": jax.random.uniform(ks[5], (output_size,), jnp.float32, -s, s),
    }


if __name__ == "__main__":
    B, T, D, H, O = 2, 8, 16, 32, 16

    key = jax.random.PRNGKey(0)
    k_x, k_p = jax.random.split(key)
    x = jax.random.normal(k_x, (B, T, D), dtype=jnp.float32)
    params = init_params(k_p, D, H, O)

    # init_hidden(batch_size): zeros of shape (num_layers, B, H)
    h0 = jnp.zeros((1, B, H), dtype=jnp.float32)
    c0 = jnp.zeros((1, B, H), dtype=jnp.float32)

    out, (h_n, c_n) = music_rnn_forward(x, (h0, c0), params)
    out = jax.block_until_ready(out)
    h_n = jax.block_until_ready(h_n)
    c_n = jax.block_until_ready(c_n)

    ref_out, (ref_h, ref_c) = _reference_forward(x, (h0, c0), params)
    assert out.shape == (B, O) and h_n.shape == (1, B, H) and c_n.shape == (1, B, H)
    assert jnp.allclose(out, ref_out, rtol=1e-4, atol=1e-4)
    assert jnp.allclose(h_n, ref_h, rtol=1e-4, atol=1e-4)
    assert jnp.allclose(c_n, ref_c, rtol=1e-4, atol=1e-4)

    print("KERNEL_OK")
</pallas_src>

<mosaic_0001>
module attributes {stable_mosaic.version = 11 : i64} {
  func.func @_lstm_fc_kernel(%arg0: i32, %arg1: memref<64x16xf32, #tpu.memory_space<vmem>>, %arg2: memref<8x32xf32, #tpu.memory_space<vmem>>, %arg3: memref<8x32xf32, #tpu.memory_space<vmem>>, %arg4: memref<16x128xf32, #tpu.memory_space<vmem>>, %arg5: memref<32x128xf32, #tpu.memory_space<vmem>>, %arg6: memref<1x128xf32, #tpu.memory_space<vmem>>, %arg7: memref<32x16xf32, #tpu.memory_space<vmem>>, %arg8: memref<1x16xf32, #tpu.memory_space<vmem>>, %arg9: memref<8x16xf32, #tpu.memory_space<vmem>>, %arg10: memref<8x32xf32, #tpu.memory_space<vmem>>, %arg11: memref<8x32xf32, #tpu.memory_space<vmem>>) attributes {dimension_semantics = [#tpu.dimension_semantics<parallel>], iteration_bounds = array<i64: 1>, scalar_prefetch = 0 : i64, scratch_operands = 0 : i64, tpu.core_type = #tpu.core_type<tc>, window_params = [{transform_indices = @transform_0, window_bounds = array<i64: 64, 16>}, {transform_indices = @transform_1, window_bounds = array<i64: 8, 32>}, {transform_indices = @transform_2, window_bounds = array<i64: 8, 32>}, {pipeline_mode = #tpu.pipeline_mode<synchronous>, transform_indices = @transform_3, window_bounds = array<i64: 16, 128>}, {pipeline_mode = #tpu.pipeline_mode<synchronous>, transform_indices = @transform_4, window_bounds = array<i64: 32, 128>}, {pipeline_mode = #tpu.pipeline_mode<synchronous>, transform_indices = @transform_5, window_bounds = array<i64: 1, 128>}, {pipeline_mode = #tpu.pipeline_mode<synchronous>, transform_indices = @transform_6, window_bounds = array<i64: 32, 16>}, {pipeline_mode = #tpu.pipeline_mode<synchronous>, transform_indices = @transform_7, window_bounds = array<i64: 1, 16>}, {transform_indices = @transform_8, window_bounds = array<i64: 8, 16>}, {transform_indices = @transform_9, window_bounds = array<i64: 8, 32>}, {transform_indices = @transform_10, window_bounds = array<i64: 8, 32>}]} {
    %c0 = arith.constant 0 : index
    %c0_0 = arith.constant 0 : index
    %0 = vector.load %arg1[%c0, %c0_0] : memref<64x16xf32, #tpu.memory_space<vmem>>, vector<64x16xf32>
    %c0_1 = arith.constant 0 : index
    %c0_2 = arith.constant 0 : index
    %1 = vector.load %arg4[%c0_1, %c0_2] : memref<16x128xf32, #tpu.memory_space<vmem>>, vector<16x128xf32>
    %cst = arith.constant dense<0.000000e+00> : vector<64x128xf32>
    %2 = tpu.matmul %0, %1, %cst {dimension_numbers = #tpu.dot_dimension_numbers<[1], [0], [0], [1], [0, 0, 1, 1], [], []>} : vector<64x16xf32>, vector<16x128xf32>, vector<64x128xf32> -> vector<64x128xf32>
    %c0_3 = arith.constant 0 : index
    %c0_4 = arith.constant 0 : index
    %3 = vector.load %arg6[%c0_3, %c0_4] : memref<1x128xf32, #tpu.memory_space<vmem>>, vector<1x128xf32>
    %4 = vector.broadcast %3 : vector<1x128xf32> to vector<64x128xf32>
    %5 = arith.addf %2, %4 : vector<64x128xf32>
    %6 = vector.shape_cast %5 : vector<64x128xf32> to vector<8x8x128xf32>
    %c0_5 = arith.constant 0 : index
    %c0_6 = arith.constant 0 : index
    %7 = vector.load %arg5[%c0_5, %c0_6] : memref<32x128xf32, #tpu.memory_space<vmem>>, vector<32x128xf32>
    %c0_7 = arith.constant 0 : index
    %c0_8 = arith.constant 0 : index
    %8 = vector.load %arg2[%c0_7, %c0_8] : memref<8x32xf32, #tpu.memory_space<vmem>>, vector<8x32xf32>
    %c0_9 = arith.constant 0 : index
    %c0_10 = arith.constant 0 : index
    %9 = vector.load %arg3[%c0_9, %c0_10] : memref<8x32xf32, #tpu.memory_space<vmem>>, vector<8x32xf32>
    %10 = vector.extract_strided_slice %6 {offsets = [0, 0, 0], sizes = [8, 1, 128], strides = [1, 1, 1]} : vector<8x8x128xf32> to vector<8x1x128xf32>
    %11 = vector.shape_cast %10 : vector<8x1x128xf32> to vector<8x128xf32>
    %cst_11 = arith.constant dense<0.000000e+00> : vector<8x128xf32>
    %12 = tpu.matmul %8, %7, %cst_11 {dimension_numbers = #tpu.dot_dimension_numbers<[1], [0], [0], [1], [0, 0, 1, 1], [], []>} : vector<8x32xf32>, vector<32x128xf32>, vector<8x128xf32> -> vector<8x128xf32>
    %13 = arith.addf %11, %12 : vector<8x128xf32>
    %14 = arith.negf %13 : vector<8x128xf32>
    %15 = math.exp %14 : vector<8x128xf32>
    %cst_12 = arith.constant 1.000000e+00 : f32
    %16 = vector.broadcast %cst_12 : f32 to vector<8x128xf32>
    %17 = arith.addf %16, %15 : vector<8x128xf32>
    %18 = arith.divf %16, %17 : vector<8x128xf32>
    %19 = math.tanh %13 : vector<8x128xf32>
    %20 = vector.extract_strided_slice %18 {offsets = [0, 0], sizes = [8, 32], strides = [1, 1]} : vector<8x128xf32> to vector<8x32xf32>
    %21 = vector.extract_strided_slice %18 {offsets = [0, 32], sizes = [8, 32], strides = [1, 1]} : vector<8x128xf32> to vector<8x32xf32>
    %22 = vector.extract_strided_slice %19 {offsets = [0, 64], sizes = [8, 32], strides = [1, 1]} : vector<8x128xf32> to vector<8x32xf32>
    %23 = vector.extract_strided_slice %18 {offsets = [0, 96], sizes = [8, 32], strides = [1, 1]} : vector<8x128xf32> to vector<8x32xf32>
    %24 = arith.mulf %21, %9 : vector<8x32xf32>
    %25 = arith.mulf %20, %22 : vector<8x32xf32>
    %26 = arith.addf %24, %25 : vector<8x32xf32>
    %27 = math.tanh %26 : vector<8x32xf32>
    %28 = arith.mulf %23, %27 : vector<8x32xf32>
    %29 = vector.extract_strided_slice %6 {offsets = [0, 1, 0], sizes = [8, 1, 128], strides = [1, 1, 1]} : vector<8x8x128xf32> to vector<8x1x128xf32>
    %30 = vector.shape_cast %29 : vector<8x1x128xf32> to vector<8x128xf32>
    %cst_13 = arith.constant dense<0.000000e+00> : vector<8x128xf32>
    %31 = tpu.matmul %28, %7, %cst_13 {dimension_numbers = #tpu.dot_dimension_numbers<[1], [0], [0], [1], [0, 0, 1, 1], [], []>} : vector<8x32xf32>, vector<32x128xf32>, vector<8x128xf32> -> vector<8x128xf32>
    %32 = arith.addf %30, %31 : vector<8x128xf32>
    %33 = arith.negf %32 : vector<8x128xf32>
    %34 = math.exp %33 : vector<8x128xf32>
    %cst_14 = arith.constant 1.000000e+00 : f32
    %35 = vector.broadcast %cst_14 : f32 to vector<8x128xf32>
    %36 = arith.addf %35, %34 : vector<8x128xf32>
    %37 = arith.divf %35, %36 : vector<8x128xf32>
    %38 = math.tanh %32 : vector<8x128xf32>
    %39 = vector.extract_strided_slice %37 {offsets = [0, 0], sizes = [8, 32], strides = [1, 1]} : vector<8x128xf32> to vector<8x32xf32>
    %40 = vector.extract_strided_slice %37 {offsets = [0, 32], sizes = [8, 32], strides = [1, 1]} : vector<8x128xf32> to vector<8x32xf32>
    %41 = vector.extract_strided_slice %38 {offsets = [0, 64], sizes = [8, 32], strides = [1, 1]} : vector<8x128xf32> to vector<8x32xf32>
    %42 = vector.extract_strided_slice %37 {offsets = [0, 96], sizes = [8, 32], strides = [1, 1]} : vector<8x128xf32> to vector<8x32xf32>
    %43 = arith.mulf %40, %26 : vector<8x32xf32>
    %44 = arith.mulf %39, %41 : vector<8x32xf32>
    %45 = arith.addf %43, %44 : vector<8x32xf32>
    %46 = math.tanh %45 : vector<8x32xf32>
    %47 = arith.mulf %42, %46 : vector<8x32xf32>
    %48 = vector.extract_strided_slice %6 {offsets = [0, 2, 0], sizes = [8, 1, 128], strides = [1, 1, 1]} : vector<8x8x128xf32> to vector<8x1x128xf32>
    %49 = vector.shape_cast %48 : vector<8x1x128xf32> to vector<8x128xf32>
    %cst_15 = arith.constant dense<0.000000e+00> : vector<8x128xf32>
    %50 = tpu.matmul %47, %7, %cst_15 {dimension_numbers = #tpu.dot_dimension_numbers<[1], [0], [0], [1], [0, 0, 1, 1], [], []>} : vector<8x32xf32>, vector<32x128xf32>, vector<8x128xf32> -> vector<8x128xf32>
    %51 = arith.addf %49, %50 : vector<8x128xf32>
    %52 = arith.negf %51 : vector<8x128xf32>
    %53 = math.exp %52 : vector<8x128xf32>
    %cst_16 = arith.constant 1.000000e+00 : f32
    %54 = vector.broadcast %cst_16 : f32 to vector<8x128xf32>
    %55 = arith.addf %54, %53 : vector<8x128xf32>
    %56 = arith.divf %54, %55 : vector<8x128xf32>
    %57 = math.tanh %51 : vector<8x128xf32>
    %58 = vector.extract_strided_slice %56 {offsets = [0, 0], sizes = [8, 32], strides = [1, 1]} : vector<8x128xf32> to vector<8x32xf32>
    %59 = vector.extract_strided_slice %56 {offsets = [0, 32], sizes = [8, 32], strides = [1, 1]} : vector<8x128xf32> to vector<8x32xf32>
    %60 = vector.extract_strided_slice %57 {offsets = [0, 64], sizes = [8, 32], strides = [1, 1]} : vector<8x128xf32> to vector<8x32xf32>
    %61 = vector.extract_strided_slice %56 {offsets = [0, 96], sizes = [8, 32], strides = [1, 1]} : vector<8x128xf32> to vector<8x32xf32>
    %62 = arith.mulf %59, %45 : vector<8x32xf32>
    %63 = arith.mulf %58, %60 : vector<8x32xf32>
    %64 = arith.addf %62, %63 : vector<8x32xf32>
    %65 = math.tanh %64 : vector<8x32xf32>
    %66 = arith.mulf %61, %65 : vector<8x32xf32>
    %67 = vector.extract_strided_slice %6 {offsets = [0, 3, 0], sizes = [8, 1, 128], strides = [1, 1, 1]} : vector<8x8x128xf32> to vector<8x1x128xf32>
    %68 = vector.shape_cast %67 : vector<8x1x128xf32> to vector<8x128xf32>
    %cst_17 = arith.constant dense<0.000000e+00> : vector<8x128xf32>
    %69 = tpu.matmul %66, %7, %cst_17 {dimension_numbers = #tpu.dot_dimension_numbers<[1], [0], [0], [1], [0, 0, 1, 1], [], []>} : vector<8x32xf32>, vector<32x128xf32>, vector<8x128xf32> -> vector<8x128xf32>
    %70 = arith.addf %68, %69 : vector<8x128xf32>
    %71 = arith.negf %70 : vector<8x128xf32>
    %72 = math.exp %71 : vector<8x128xf32>
    %cst_18 = arith.constant 1.000000e+00 : f32
    %73 = vector.broadcast %cst_18 : f32 to vector<8x128xf32>
    %74 = arith.addf %73, %72 : vector<8x128xf32>
    %75 = arith.divf %73, %74 : vector<8x128xf32>
    %76 = math.tanh %70 : vector<8x128xf32>
    %77 = vector.extract_strided_slice %75 {offsets = [0, 0], sizes = [8, 32], strides = [1, 1]} : vector<8x128xf32> to vector<8x32xf32>
    %78 = vector.extract_strided_slice %75 {offsets = [0, 32], sizes = [8, 32], strides = [1, 1]} : vector<8x128xf32> to vector<8x32xf32>
    %79 = vector.extract_strided_slice %76 {offsets = [0, 64], sizes = [8, 32], strides = [1, 1]} : vector<8x128xf32> to vector<8x32xf32>
    %80 = vector.extract_strided_slice %75 {offsets = [0, 96], sizes = [8, 32], strides = [1, 1]} : vector<8x128xf32> to vector<8x32xf32>
    %81 = arith.mulf %78, %64 : vector<8x32xf32>
    %82 = arith.mulf %77, %79 : vector<8x32xf32>
    %83 = arith.addf %81, %82 : vector<8x32xf32>
    %84 = math.tanh %83 : vector<8x32xf32>
    %85 = arith.mulf %80, %84 : vector<8x32xf32>
    %86 = vector.extract_strided_slice %6 {offsets = [0, 4, 0], sizes = [8, 1, 128], strides = [1, 1, 1]} : vector<8x8x128xf32> to vector<8x1x128xf32>
    %87 = vector.shape_cast %86 : vector<8x1x128xf32> to vector<8x128xf32>
    %cst_19 = arith.constant dense<0.000000e+00> : vector<8x128xf32>
    %88 = tpu.matmul %85, %7, %cst_19 {dimension_numbers = #tpu.dot_dimension_numbers<[1], [0], [0], [1], [0, 0, 1, 1], [], []>} : vector<8x32xf32>, vector<32x128xf32>, vector<8x128xf32> -> vector<8x128xf32>
    %89 = arith.addf %87, %88 : vector<8x128xf32>
    %90 = arith.negf %89 : vector<8x128xf32>
    %91 = math.exp %90 : vector<8x128xf32>
    %cst_20 = arith.constant 1.000000e+00 : f32
    %92 = vector.broadcast %cst_20 : f32 to vector<8x128xf32>
    %93 = arith.addf %92, %91 : vector<8x128xf32>
    %94 = arith.divf %92, %93 : vector<8x128xf32>
    %95 = math.tanh %89 : vector<8x128xf32>
    %96 = vector.extract_strided_slice %94 {offsets = [0, 0], sizes = [8, 32], strides = [1, 1]} : vector<8x128xf32> to vector<8x32xf32>
    %97 = vector.extract_strided_slice %94 {offsets = [0, 32], sizes = [8, 32], strides = [1, 1]} : vector<8x128xf32> to vector<8x32xf32>
    %98 = vector.extract_strided_slice %95 {offsets = [0, 64], sizes = [8, 32], strides = [1, 1]} : vector<8x128xf32> to vector<8x32xf32>
    %99 = vector.extract_strided_slice %94 {offsets = [0, 96], sizes = [8, 32], strides = [1, 1]} : vector<8x128xf32> to vector<8x32xf32>
    %100 = arith.mulf %97, %83 : vector<8x32xf32>
    %101 = arith.mulf %96, %98 : vector<8x32xf32>
    %102 = arith.addf %100, %101 : vector<8x32xf32>
    %103 = math.tanh %102 : vector<8x32xf32>
    %104 = arith.mulf %99, %103 : vector<8x32xf32>
    %105 = vector.extract_strided_slice %6 {offsets = [0, 5, 0], sizes = [8, 1, 128], strides = [1, 1, 1]} : vector<8x8x128xf32> to vector<8x1x128xf32>
    %106 = vector.shape_cast %105 : vector<8x1x128xf32> to vector<8x128xf32>
    %cst_21 = arith.constant dense<0.000000e+00> : vector<8x128xf32>
    %107 = tpu.matmul %104, %7, %cst_21 {dimension_numbers = #tpu.dot_dimension_numbers<[1], [0], [0], [1], [0, 0, 1, 1], [], []>} : vector<8x32xf32>, vector<32x128xf32>, vector<8x128xf32> -> vector<8x128xf32>
    %108 = arith.addf %106, %107 : vector<8x128xf32>
    %109 = arith.negf %108 : vector<8x128xf32>
    %110 = math.exp %109 : vector<8x128xf32>
    %cst_22 = arith.constant 1.000000e+00 : f32
    %111 = vector.broadcast %cst_22 : f32 to vector<8x128xf32>
    %112 = arith.addf %111, %110 : vector<8x128xf32>
    %113 = arith.divf %111, %112 : vector<8x128xf32>
    %114 = math.tanh %108 : vector<8x128xf32>
    %115 = vector.extract_strided_slice %113 {offsets = [0, 0], sizes = [8, 32], strides = [1, 1]} : vector<8x128xf32> to vector<8x32xf32>
    %116 = vector.extract_strided_slice %113 {offsets = [0, 32], sizes = [8, 32], strides = [1, 1]} : vector<8x128xf32> to vector<8x32xf32>
    %117 = vector.extract_strided_slice %114 {offsets = [0, 64], sizes = [8, 32], strides = [1, 1]} : vector<8x128xf32> to vector<8x32xf32>
    %118 = vector.extract_strided_slice %113 {offsets = [0, 96], sizes = [8, 32], strides = [1, 1]} : vector<8x128xf32> to vector<8x32xf32>
    %119 = arith.mulf %116, %102 : vector<8x32xf32>
    %120 = arith.mulf %115, %117 : vector<8x32xf32>
    %121 = arith.addf %119, %120 : vector<8x32xf32>
    %122 = math.tanh %121 : vector<8x32xf32>
    %123 = arith.mulf %118, %122 : vector<8x32xf32>
    %124 = vector.extract_strided_slice %6 {offsets = [0, 6, 0], sizes = [8, 1, 128], strides = [1, 1, 1]} : vector<8x8x128xf32> to vector<8x1x128xf32>
    %125 = vector.shape_cast %124 : vector<8x1x128xf32> to vector<8x128xf32>
    %cst_23 = arith.constant dense<0.000000e+00> : vector<8x128xf32>
    %126 = tpu.matmul %123, %7, %cst_23 {dimension_numbers = #tpu.dot_dimension_numbers<[1], [0], [0], [1], [0, 0, 1, 1], [], []>} : vector<8x32xf32>, vector<32x128xf32>, vector<8x128xf32> -> vector<8x128xf32>
    %127 = arith.addf %125, %126 : vector<8x128xf32>
    %128 = arith.negf %127 : vector<8x128xf32>
    %129 = math.exp %128 : vector<8x128xf32>
    %cst_24 = arith.constant 1.000000e+00 : f32
    %130 = vector.broadcast %cst_24 : f32 to vector<8x128xf32>
    %131 = arith.addf %130, %129 : vector<8x128xf32>
    %132 = arith.divf %130, %131 : vector<8x128xf32>
    %133 = math.tanh %127 : vector<8x128xf32>
    %134 = vector.extract_strided_slice %132 {offsets = [0, 0], sizes = [8, 32], strides = [1, 1]} : vector<8x128xf32> to vector<8x32xf32>
    %135 = vector.extract_strided_slice %132 {offsets = [0, 32], sizes = [8, 32], strides = [1, 1]} : vector<8x128xf32> to vector<8x32xf32>
    %136 = vector.extract_strided_slice %133 {offsets = [0, 64], sizes = [8, 32], strides = [1, 1]} : vector<8x128xf32> to vector<8x32xf32>
    %137 = vector.extract_strided_slice %132 {offsets = [0, 96], sizes = [8, 32], strides = [1, 1]} : vector<8x128xf32> to vector<8x32xf32>
    %138 = arith.mulf %135, %121 : vector<8x32xf32>
    %139 = arith.mulf %134, %136 : vector<8x32xf32>
    %140 = arith.addf %138, %139 : vector<8x32xf32>
    %141 = math.tanh %140 : vector<8x32xf32>
    %142 = arith.mulf %137, %141 : vector<8x32xf32>
    %143 = vector.extract_strided_slice %6 {offsets = [0, 7, 0], sizes = [8, 1, 128], strides = [1, 1, 1]} : vector<8x8x128xf32> to vector<8x1x128xf32>
    %144 = vector.shape_cast %143 : vector<8x1x128xf32> to vector<8x128xf32>
    %cst_25 = arith.constant dense<0.000000e+00> : vector<8x128xf32>
    %145 = tpu.matmul %142, %7, %cst_25 {dimension_numbers = #tpu.dot_dimension_numbers<[1], [0], [0], [1], [0, 0, 1, 1], [], []>} : vector<8x32xf32>, vector<32x128xf32>, vector<8x128xf32> -> vector<8x128xf32>
    %146 = arith.addf %144, %145 : vector<8x128xf32>
    %147 = arith.negf %146 : vector<8x128xf32>
    %148 = math.exp %147 : vector<8x128xf32>
    %cst_26 = arith.constant 1.000000e+00 : f32
    %149 = vector.broadcast %cst_26 : f32 to vector<8x128xf32>
    %150 = arith.addf %149, %148 : vector<8x128xf32>
    %151 = arith.divf %149, %150 : vector<8x128xf32>
    %152 = math.tanh %146 : vector<8x128xf32>
    %153 = vector.extract_strided_slice %151 {offsets = [0, 0], sizes = [8, 32], strides = [1, 1]} : vector<8x128xf32> to vector<8x32xf32>
    %154 = vector.extract_strided_slice %151 {offsets = [0, 32], sizes = [8, 32], strides = [1, 1]} : vector<8x128xf32> to vector<8x32xf32>
    %155 = vector.extract_strided_slice %152 {offsets = [0, 64], sizes = [8, 32], strides = [1, 1]} : vector<8x128xf32> to vector<8x32xf32>
    %156 = vector.extract_strided_slice %151 {offsets = [0, 96], sizes = [8, 32], strides = [1, 1]} : vector<8x128xf32> to vector<8x32xf32>
    %157 = arith.mulf %154, %140 : vector<8x32xf32>
    %158 = arith.mulf %153, %155 : vector<8x32xf32>
    %159 = arith.addf %157, %158 : vector<8x32xf32>
    %160 = math.tanh %159 : vector<8x32xf32>
    %161 = arith.mulf %156, %160 : vector<8x32xf32>
    %c0_27 = arith.constant 0 : index
    %c0_28 = arith.constant 0 : index
    %162 = vector.load %arg7[%c0_27, %c0_28] : memref<32x16xf32, #tpu.memory_space<vmem>>, vector<32x16xf32>
    %cst_29 = arith.constant dense<0.000000e+00> : vector<8x16xf32>
    %163 = tpu.matmul %161, %162, %cst_29 {dimension_numbers = #tpu.dot_dimension_numbers<[1], [0], [0], [1], [0, 0, 1, 1], [], []>} : vector<8x32xf32>, vector<32x16xf32>, vector<8x16xf32> -> vector<8x16xf32>
    %c0_30 = arith.constant 0 : index
    %c0_31 = arith.constant 0 : index
    %164 = vector.load %arg8[%c0_30, %c0_31] : memref<1x16xf32, #tpu.memory_space<vmem>>, vector<1x16xf32>
    %165 = vector.broadcast %164 : vector<1x16xf32> to vector<8x16xf32>
    %166 = arith.addf %163, %165 : vector<8x16xf32>
    %c0_32 = arith.constant 0 : index
    %c0_33 = arith.constant 0 : index
    %167 = vector.load %arg9[%c0_32, %c0_33] : memref<8x16xf32, #tpu.memory_space<vmem>>, vector<8x16xf32>
    tpu.vector_store %arg9[%c0_32, %c0_33], %166 {strides = array<i32>} : memref<8x16xf32, #tpu.memory_space<vmem>>, vector<8x16xf32>,
    %c0_34 = arith.constant 0 : index
    %c0_35 = arith.constant 0 : index
    %168 = vector.load %arg10[%c0_34, %c0_35] : memref<8x32xf32, #tpu.memory_space<vmem>>, vector<8x32xf32>
    tpu.vector_store %arg10[%c0_34, %c0_35], %161 {strides = array<i32>} : memref<8x32xf32, #tpu.memory_space<vmem>>, vector<8x32xf32>,
    %c0_36 = arith.constant 0 : index
    %c0_37 = arith.constant 0 : index
    %169 = vector.load %arg11[%c0_36, %c0_37] : memref<8x32xf32, #tpu.memory_space<vmem>>, vector<8x32xf32>
    tpu.vector_store %arg11[%c0_36, %c0_37], %159 {strides = array<i32>} : memref<8x32xf32, #tpu.memory_space<vmem>>, vector<8x32xf32>,
    return
  }
  func.func @transform_0(%arg0: i32) -> (i32, i32) {
    %c0_i32 = arith.constant 0 : i32
    %c0_i32_0 = arith.constant 0 : i32
    return %arg0, %c0_i32 : i32, i32
  }
  func.func @transform_1(%arg0: i32) -> (i32, i32) {
    %c0_i32 = arith.constant 0 : i32
    %c0_i32_0 = arith.constant 0 : i32
    return %arg0, %c0_i32 : i32, i32
  }
  func.func @transform_2(%arg0: i32) -> (i32, i32) {
    %c0_i32 = arith.constant 0 : i32
    %c0_i32_0 = arith.constant 0 : i32
    return %arg0, %c0_i32 : i32, i32
  }
  func.func @transform_3(%arg0: i32) -> (i32, i32) {
    %c0_i32 = arith.constant 0 : i32
    %c0_i32_0 = arith.constant 0 : i32
    %c0_i32_1 = arith.constant 0 : i32
    return %c0_i32, %c0_i32_0 : i32, i32
  }
  func.func @transform_4(%arg0: i32) -> (i32, i32) {
    %c0_i32 = arith.constant 0 : i32
    %c0_i32_0 = arith.constant 0 : i32
    %c0_i32_1 = arith.constant 0 : i32
    return %c0_i32, %c0_i32_0 : i32, i32
  }
  func.func @transform_5(%arg0: i32) -> (i32, i32) {
    %c0_i32 = arith.constant 0 : i32
    %c0_i32_0 = arith.constant 0 : i32
    %c0_i32_1 = arith.constant 0 : i32
    return %c0_i32, %c0_i32_0 : i32, i32
  }
  func.func @transform_6(%arg0: i32) -> (i32, i32) {
    %c0_i32 = arith.constant 0 : i32
    %c0_i32_0 = arith.constant 0 : i32
    %c0_i32_1 = arith.constant 0 : i32
    return %c0_i32, %c0_i32_0 : i32, i32
  }
  func.func @transform_7(%arg0: i32) -> (i32, i32) {
    %c0_i32 = arith.constant 0 : i32
    %c0_i32_0 = arith.constant 0 : i32
    %c0_i32_1 = arith.constant 0 : i32
    return %c0_i32, %c0_i32_0 : i32, i32
  }
  func.func @transform_8(%arg0: i32) -> (i32, i32) {
    %c0_i32 = arith.constant 0 : i32
    %c0_i32_0 = arith.constant 0 : i32
    return %arg0, %c0_i32 : i32, i32
  }
  func.func @transform_9(%arg0: i32) -> (i32, i32) {
    %c0_i32 = arith.constant 0 : i32
    %c0_i32_0 = arith.constant 0 : i32
    return %arg0, %c0_i32 : i32, i32
  }
  func.func @transform_10(%arg0: i32) -> (i32, i32) {
    %c0_i32 = arith.constant 0 : i32
    %c0_i32_0 = arith.constant 0 : i32
    return %arg0, %c0_i32 : i32, i32
  }
}

</mosaic_0001>

<bundles_post_ra>
// kernel: tpu_custom_call.1
= control target key start
LH: loop header
LB: loop body
LE: loop exit
PB: predicated region body
PF: predicated region fallthrough
CT: control target
= control target key end

     0   :  { %16 = vsyncpa [#allocation3], 0  ;;  %v3911_v3 = vmov 0.0   ;;  %vm51_vm0 = vcmask 130048   ;;  %s5098_s0 = inlined_call_operand.vmem [shape: f32[64,16], index: 0, kind: input, shape index: {}]   ;;  %s5099_s1 = inlined_call_operand.vmem [shape: f32[8,32], index: 1, kind: input, shape index: {}]   ;;  %s5100_s2 = inlined_call_operand.vmem [shape: f32[8,32], index: 2, kind: input, shape index: {}]   ;;  %s5101_s3 = inlined_call_operand.vmem [shape: f32[16,128], index: 3, kind: input, shape index: {}]   ;;  %s5102_s4 = inlined_call_operand.vmem [shape: f32[32,128], index: 4, kind: input, shape index: {}]   ;;  %s5103_s5 = inlined_call_operand.vmem [shape: f32[1,128], index: 5, kind: input, shape index: {}]   ;;  %s5104_s6 = inlined_call_operand.vmem [shape: f32[32,16], index: 6, kind: input, shape index: {}]   ;;  %s5105_s7 = inlined_call_operand.vmem [shape: f32[1,16], index: 7, kind: input, shape index: {}]   ;;  %s5106_s8 = inlined_call_operand.hbm [shape: f32[8,16], index: 8, kind: output, shape index: {0}]   ;;  %s5107_s9 = inlined_call_operand.hbm [shape: f32[8,32], index: 9, kind: output, shape index: {1}]   ;;  %s5108_s10 = inlined_call_operand.hbm [shape: f32[8,32], index: 10, kind: output, shape index: {2}]  }
   0x1   :  { %v43_v0 = vld [vmem:[%s5101_s3 + $0x8] sm:$0xff]  ;;  %v3980_v1 = vld [vmem:[%s5102_s4 + $0x18] sm:$0xff]  ;;  %v42_v2 = vld [vmem:[%s5101_s3] sm:$0xff]  ;;  %3223 = vmatprep.subr.mxu1 %v3911_v3 }
   0x2   :  { %3207 = vmatprep.subr.mxu0 %v43_v0  ;;  %v34_v4 = vld [vmem:[%s5098_s0] sm:$0xff]  ;;  %3224 = vmatpush3.msra.mxu1 %v3980_v1  ;;  %v3993_v5 = vld [vmem:[%s5102_s4 + $0x10] sm:$0xff]  ;;  %v35_v6 = vld [vmem:[%s5098_s0 + $0x8] sm:$0xff] }
   0x3   :  { %3208 = vmatpush3.msra.mxu0 %v43_v0  ;;  %3225 = vmatprep.subr.mxu1 %v3911_v3  ;;  %v36_v7 = vld [vmem:[%s5098_s0 + $0x10] sm:$0xff]  ;;  %v4006_v8 = vld [vmem:[%s5102_s4 + $0x8] sm:$0xff] }
   0x4   :  { %3209 = vmatprep.subr.mxu0 %v42_v2  ;;  %3211 = vmatprep.mubr.msk.f32.mxu0 %vm51_vm0, %v34_v4 }
   0x5   :  { %3210 = vmatpush3.msra.mxu0 %v42_v2  ;;  %3226 = vmatpush3.msra.mxu1 %v3993_v5 }
   0x6   :  { %3212 = vmatmul.mubr.msk.f32.vlgmr.msra.gmra.mxu0 %vm51_vm0, %v35_v6 }
   0x7   :  { %17 = vsyncpa [#allocation5], 0  ;;  %3227 = vmatprep.subr.mxu1 %v3911_v3  ;;  %3214 = vmatprep.mubr.msk.f32.mxu0 %vm51_vm0, %v36_v7  ;;  %v4015_v9 = vld [vmem:[%s5102_s4] sm:$0xff]  ;;  %v37_v10 = vld [vmem:[%s5098_s0 + $0x18] sm:$0xff]  ;;  %vm3912_vm1 = vmmov 0   ;;  %vm187_vm2 = vcmask 261120  }
   0x8   :  { %3228 = vmatpush3.msra.mxu1 %v4006_v8  ;;  %3231 = vmatprep.mubr.msk.f32.mxu1 %vm3912_vm1, %v3911_v3  ;;  %v185_v11 = vld [vmem:[%s5099_s1] sm:$0xff]  ;;  %v39_v13 = vld [vmem:[%s5098_s0 + $0x28] sm:$0xff]  ;;  %v40_v14 = vld [vmem:[%s5098_s0 + $0x30] sm:$0xff]  ;;  %s3914_s24 = smov 32   ;;  %vm518_vm3 = vcmask 1041409   ;;  %vm521_vm4 = vcmask 1042434  }
   0x9   :  { %v38_v12 = vld [vmem:[%s5098_s0 + $0x20] sm:$0xff]  ;;  %3229 = vmatprep.subr.mxu1 %v3911_v3  ;;  %3245 = vmatprep.subr.mxu0 %v3911_v3  ;;  %v41_v15 = vld [vmem:[%s5098_s0 + $0x38] sm:$0xff]  ;;  %vm524_vm5 = vcmask 1043459   ;;  %vm527_vm6 = vcmask 1044484   ;;  %vm530_vm7 = vcmask 1045509   ;;  %vm533_vm8 = vcmask 1046534  }
   0xa   :  { %3230 = vmatpush3.msra.mxu1 %v4015_v9  ;;  %3215 = vmatmul.mubr.msk.f32.gmra.mxu0 %vm51_vm0, %v37_v10  ;;  %v3069_v17 = vld [vmem:[%s5103_s5] ss:$0 sm:$0xff]  ;;  %s3913_s5 = smov 64   ;;  %vm536_vm9 = vcmask 1047559   ;;  %s3915_s19 = smov 96   ;;  %vm2995_vm10 = vcmask 261127  }
   0xb   :  { %3232 = vmatmul.mubr.msk.f32.vlgmr.msra.gmra.mxu1 %vm187_vm2, %v185_v11  ;;  %3217 = vmatprep.mubr.msk.f32.mxu0 %vm51_vm0, %v38_v12  ;;  %v186_v56 = vld [vmem:[%s5100_s2] sm:$0xff]  ;;  %vm2997_vm11 = vcmask 260096  }
   0xc   :  { %3234 = vmatprep.subr.mxu1 %v3911_v3  ;;  %3242 = vmatprep.mubr.msk.f32.mxu1 %vm3912_vm1, %v3911_v3  ;;  %v343_v58 = vrot.slane %v186_v56, 2  ;;  %v342_v60 = vrot.slane %v186_v56, 1  ;;  %v344_v61 = vrot.slane %v186_v56, 3  ;;  %v345_v62 = vrot.slane %v186_v56, 4 }
   0xd   :  { %3235 = vmatpush3.msra.mxu1 %v3980_v1  ;;  %3246 = vmatpush3.msra.mxu0 %v3980_v1  ;;  %v347_v63 = vrot.slane %v186_v56, 6  ;;  %v346_v0 = vrot.slane %v186_v56, 5  ;;  %v348_v2 = vrot.slane %v186_v56, 7 }
   0xe   :  { %3218 = vmatmul.mubr.msk.f32.gmra.mxu0 %vm51_vm0, %v39_v13  ;;  %3236 = vmatprep.subr.mxu1 %v3911_v3 }
   0xf   :  { %3220 = vmatprep.mubr.msk.f32.mxu0 %vm51_vm0, %v40_v14  ;;  %3237 = vmatpush3.msra.mxu1 %v3993_v5 }
  0x10   :  { %3238 = vmatprep.subr.mxu1 %v3911_v3  ;;  %3247 = vmatprep.subr.mxu0 %v3911_v3 }
  0x11   :  { %3239 = vmatpush3.msra.mxu1 %v4006_v8  ;;  %3248 = vmatpush3.msra.mxu0 %v3993_v5 }
  0x12   :  { %3221 = vmatmul.mubr.msk.f32.gmra.mxu0 %vm51_vm0, %v41_v15  ;;  %3240 = vmatprep.subr.mxu1 %v3911_v3 }
  0x13   :  { %3241 = vmatpush3.msra.mxu1 %v4015_v9  ;;  %3249 = vmatprep.subr.mxu0 %v3911_v3 }
  0x14   :  { %3250 = vmatpush3.msra.mxu0 %v4006_v8  ;;  %3253 = vmatprep.mubr.msk.f32.mxu0 %vm3912_vm1, %v3911_v3 }
  0x15   :  { %3251 = vmatprep.subr.mxu0 %v3911_v3  ;;  %3256 = vmatprep.subr.mxu1 %v3911_v3 }
  0x16   :  { %3252 = vmatpush3.msra.mxu0 %v4015_v9 }
  0x17   :  { %3267 = vmatprep.subr.mxu0 %v3911_v3 }
  0xc6   :  { %v3213_v16 = vpop.f32.mrf.mxu0 }
  0xc7   :  { %v4078_v27 = vadd.f32 %v3213_v16, %v3069_v17 }
  0xc8   :  { %v142_v18 = vpop.f32.mrf.mxu0 }
  0xc9   :  { %v4071_v19 = vadd.f32 %v3069_v17, %v142_v18 }
  0xca   :  { %v3216_v20 = vpop.f32.mrf.mxu0 }
  0xcb   :  { %v4073_v21 = vadd.f32 %v3216_v20, %v3069_v17  ;;  %v257_v22 = vpop.f32.mrf.mxu1 }
  0xcc   :  { %v264_v23 = vrot.slane %v257_v22, 3  ;;  %v152_v24 = vpop.f32.mrf.mxu0  ;;  %v4076_v26 = vadd.f32 %v257_v22, %v4071_v19  ;;  %v262_v29 = vrot.slane %v257_v22, 1  ;;  %v263_v34 = vrot.slane %v257_v22, 2 }
  0xcd   :  { %v3233_v25 = vpop.f32.mrf.mxu1  ;;  %v4082_v31 = vadd.f32 %v3069_v17, %v152_v24  ;;  %v266_v37 = vrot.slane %v257_v22, 5  ;;  %v265_v41 = vrot.slane %v257_v22, 4  ;;  %v268_v44 = vrot.slane %v257_v22, 7 }
  0xce   :  { %v3219_v28 = vpop.f32.mrf.mxu0  ;;  %v280_v30 = vadd.f32 %v264_v23, %v4073_v21  ;;  %3330 = vtanh.f32 %v4076_v26  ;;  %v278_v33 = vadd.f32 %v262_v29, %v4078_v27  ;;  %v267_v47 = vrot.slane %v257_v22, 6 }
  0xcf   :  { %v4085_v35 = vadd.f32 %v3219_v28, %v3069_v17  ;;  %v279_v38 = vadd.f32 %v263_v34, %v4082_v31  ;;  %v3079_v4 = vmul.f32 -1.442695, %v4076_v26 }
  0xd0   :  { %v162_v32 = vpop.f32.mrf.mxu0  ;;  %3332 = vtanh.f32 %v280_v30  ;;  %v3082_v6 = vmul.f32 -1.442695, %v280_v30  ;;  %v3080_v7 = vmul.f32 -1.442695, %v278_v33 }
  0xd1   :  { %v4088_v39 = vadd.f32 %v3069_v17, %v162_v32  ;;  %3334 = vtanh.f32 %v278_v33  ;;  %v282_v42 = vadd.f32 %v266_v37, %v4085_v35  ;;  %v3081_v10 = vmul.f32 -1.442695, %v279_v38 }
  0xd2   :  { %v3222_v36 = vpop.f32.mrf.mxu0  ;;  %3336 = vtanh.f32 %v279_v38 }
  0xd3   :  { %v4091_v43 = vadd.f32 %v3222_v36, %v3069_v17  ;;  %v281_v45 = vadd.f32 %v265_v41, %v4088_v39  ;;  %3338 = vtanh.f32 %v282_v42  ;;  %v3084_v11 = vmul.f32 -1.442695, %v282_v42 }
  0xd4   :  { %v172_v40 = vpop.f32.mrf.mxu0 }
  0xd5   :  { %v4094_v46 = vadd.f32 %v3069_v17, %v172_v40  ;;  %v284_v48 = vadd.f32 %v268_v44, %v4091_v43  ;;  %3340 = vtanh.f32 %v281_v45  ;;  %v3083_v12 = vmul.f32 -1.442695, %v281_v45 }
  0xd7   :  { %v283_v50 = vadd.f32 %v267_v47, %v4094_v46  ;;  %3342 = vtanh.f32 %v284_v48  ;;  %v3086_v15 = vmul.f32 -1.442695, %v284_v48 }
  0xd9   :  { %3344 = vtanh.f32 %v283_v50  ;;  %v3085_v14 = vmul.f32 -1.442695, %v283_v50 }
  0xda   :  { %3346 = vpow2.f32 %v3079_v4 }
  0xdb   :  { %v3331_v49 = vpop.eup %3330  ;;  %3348 = vpow2.f32 %v3082_v6 }
  0xdc   :  { %389 = vrot.lane.b32.xlu1 %v3331_v49, %s3913_s5  ;;  %3350 = vpow2.f32 %v3080_v7 }
  0xdd   :  { %v3333_v51 = vpop.eup %3332  ;;  %3352 = vpow2.f32 %v3081_v10 }
  0xde   :  { %v3335_v52 = vpop.eup %3334  ;;  %3354 = vpow2.f32 %v3084_v11 }
  0xdf   :  { %391 = vrot.lane.b32.xlu0 %v3335_v52, %s3913_s5  ;;  %v3337_v53 = vpop.eup %3336  ;;  %3356 = vpow2.f32 %v3083_v12 }
  0xe0   :  { %395 = vrot.lane.b32.xlu1 %v3333_v51, %s3913_s5  ;;  %v3339_v54 = vpop.eup %3338  ;;  %3358 = vpow2.f32 %v3085_v14 }
  0xe1   :  { %3360 = vpow2.f32 %v3086_v15 }
  0xe2   :  { %v3341_v55 = vpop.eup %3340 }
  0xe3   :  { %393 = vrot.lane.b32.xlu0 %v3337_v53, %s3913_s5 }
  0xe4   :  { %399 = vrot.lane.b32.xlu1 %v3339_v54, %s3913_s5  ;;  %v3343_v57 = vpop.eup %3342 }
  0xe6   :  { %v3345_v59 = vpop.eup %3344 }
  0xe7   :  { %397 = vrot.lane.b32.xlu0 %v3341_v55, %s3913_s5  ;;  %v3347_v13 = vpop.eup %3346 }
  0xe8   :  { %403 = vrot.lane.b32.xlu1 %v3343_v57, %s3913_s5  ;;  %v309_v16 = vadd.f32 1.0, %v3347_v13  ;;  %v3349_v17 = vpop.eup %3348 }
  0xe9   :  { %v3351_v18 = vpop.eup %3350  ;;  %v312_v20 = vadd.f32 1.0, %v3349_v17 }
  0xea   :  { %3362 = vrcp.f32 %v309_v16  ;;  %v310_v22 = vadd.f32 1.0, %v3351_v18  ;;  %v3353_v23 = vpop.eup %3352 }
  0xeb   :  { %401 = vrot.lane.b32.xlu0 %v3345_v59, %s3913_s5  ;;  %v3355_v24 = vpop.eup %3354  ;;  %3364 = vrcp.f32 %v312_v20  ;;  %v311_v25 = vadd.f32 1.0, %v3353_v23 }
  0xec   :  { %353 = vrot.lane.b32.xlu1 %v343_v58, %s3914_s24  ;;  %3366 = vrcp.f32 %v310_v22  ;;  %v314_v26 = vadd.f32 1.0, %v3355_v24  ;;  %v3357_v28 = vpop.eup %3356 }
  0xed   :  { %3368 = vrcp.f32 %v311_v25  ;;  %v3359_v29 = vpop.eup %3358  ;;  %v313_v30 = vadd.f32 1.0, %v3357_v28 }
  0xee   :  { %3370 = vrcp.f32 %v314_v26  ;;  %v3361_v32 = vpop.eup %3360  ;;  %v315_v36 = vadd.f32 1.0, %v3359_v29 }
  0xef   :  { %351 = vrot.lane.b32.xlu0 %v342_v60, %s3914_s24  ;;  %3372 = vrcp.f32 %v313_v30  ;;  %v316_v38 = vadd.f32 1.0, %v3361_v32 }
  0xf0   :  { %355 = vrot.lane.b32.xlu1 %v344_v61, %s3914_s24  ;;  %3374 = vrcp.f32 %v315_v36 }
  0xf1   :  { %3376 = vrcp.f32 %v316_v38 }
  0xf3   :  { %349 = vrot.lane.b32.xlu0 %v186_v56, %s3914_s24 }
  0xf4   :  { %357 = vrot.lane.b32.xlu1 %v345_v62, %s3914_s24 }
  0xf7   :  { %361 = vrot.lane.b32.xlu0 %v347_v63, %s3914_s24  ;;  %v4118_v33 = vpop.eup %3362 }
  0xf8   :  { %359 = vrot.lane.b32.xlu1 %v346_v0, %s3914_s24  ;;  %v4122_v40 = vpop.eup %3364 }
  0xf9   :  { %v4124_v42 = vpop.eup %3366 }
  0xfa   :  { %v4130_v48 = vpop.eup %3368 }
  0xfb   :  { %363 = vrot.lane.b32.xlu0 %v348_v2, %s3914_s24  ;;  %v4133_v51 = vpop.eup %3370 }
  0xfc   :  { %v4138_v55 = vpop.eup %3372 }
  0xfd   :  { %v4141_v57 = vpop.eup %3374 }
  0xfe   :  { %v4145_v61 = vpop.eup %3376 }
 0x14e   :  { %v390_v34 = vpop.permute.xlu1 %389 }
 0x14f   :  { %v413_v37 = vmul.f32 %v4118_v33, %v390_v34 }
 0x151   :  { %429 = vrot.lane.b32.xlu0 %v413_v37, %s3914_s24  ;;  %v392_v44 = vpop.permute.xlu0 %391 }
 0x152   :  { %v396_v41 = vpop.permute.xlu1 %395  ;;  %v414_v47 = vmul.f32 %v4124_v42, %v392_v44 }
 0x153   :  { %v416_v45 = vmul.f32 %v4122_v40, %v396_v41 }
 0x155   :  { %435 = vrot.lane.b32.xlu1 %v416_v45, %s3914_s24  ;;  %431 = vrot.lane.b32.xlu0 %v414_v47, %s3914_s24  ;;  %v394_v49 = vpop.permute.xlu0 %393 }
 0x156   :  { %v415_v50 = vmul.f32 %v4130_v48, %v394_v49  ;;  %v400_v52 = vpop.permute.xlu1 %399 }
 0x157   :  { %v418_v53 = vmul.f32 %v4133_v51, %v400_v52 }
 0x159   :  { %433 = vrot.lane.b32.xlu0 %v415_v50, %s3914_s24  ;;  %v398_v54 = vpop.permute.xlu0 %397  ;;  %439 = vrot.lane.b32.xlu1 %v418_v53, %s3914_s24 }
 0x15a   :  { %v417_v56 = vmul.f32 %v4138_v55, %v398_v54  ;;  %v404_v58 = vpop.permute.xlu1 %403 }
 0x15b   :  { %v420_v62 = vmul.f32 %v4145_v61, %v404_v58 }
 0x15d   :  { %v402_v59 = vpop.permute.xlu0 %401  ;;  %437 = vrot.lane.b32.xlu1 %v417_v56, %s3914_s24 }
 0x15e   :  { %v419_v60 = vmul.f32 %v4141_v57, %v402_v59  ;;  %v354_v0 = vpop.permute.xlu1 %353 }
 0x15f   :  { %v375_v23 = vmul.f32 %v4130_v48, %v354_v0 }
 0x160   :  { %441 = vrot.lane.b32.xlu0 %v419_v60, %s3914_s24 }
 0x161   :  { %443 = vrot.lane.b32.xlu1 %v420_v62, %s3914_s24  ;;  %v352_v63 = vpop.permute.xlu0 %351 }
 0x162   :  { %v356_v4 = vpop.permute.xlu1 %355  ;;  %v374_v16 = vmul.f32 %v4124_v42, %v352_v63 }
 0x163   :  { %v376_v15 = vmul.f32 %v4122_v40, %v356_v4 }
 0x165   :  { %v350_v2 = vpop.permute.xlu0 %349 }
 0x166   :  { %v358_v7 = vpop.permute.xlu1 %357  ;;  %v373_v11 = vmul.f32 %v4118_v33, %v350_v2 }
 0x167   :  { %v377_v30 = vmul.f32 %v4138_v55, %v358_v7 }
 0x169   :  { %v362_v6 = vpop.permute.xlu0 %361 }
 0x16a   :  { %v360_v12 = vpop.permute.xlu1 %359  ;;  %v379_v36 = vmul.f32 %v4141_v57, %v362_v6 }
 0x16b   :  { %v378_v25 = vmul.f32 %v4133_v51, %v360_v12 }
 0x16d   :  { %v364_v10 = vpop.permute.xlu0 %363 }
 0x16e   :  { %v380_v41 = vmul.f32 %v4145_v61, %v364_v10 }
 0x1c3   :  { %v430_v13 = vpop.permute.xlu0 %429 }
 0x1c4   :  { %v4151_v14 = vadd.f32 %v430_v13, %v373_v11 }
 0x1c6   :  { %3378 = vtanh.f32 %v4151_v14 }
 0x1c7   :  { %v436_v17 = vpop.permute.xlu1 %435  ;;  %v432_v20 = vpop.permute.xlu0 %431 }
 0x1c8   :  { %v4156_v18 = vadd.f32 %v436_v17, %v376_v15  ;;  %v4158_v22 = vadd.f32 %v432_v20, %v374_v16 }
 0x1ca   :  { %3380 = vtanh.f32 %v4156_v18 }
 0x1cb   :  { %3382 = vtanh.f32 %v4158_v22  ;;  %v434_v24 = vpop.permute.xlu0 %433  ;;  %v440_v28 = vpop.permute.xlu1 %439 }
 0x1cc   :  { %v4164_v26 = vadd.f32 %v434_v24, %v375_v23  ;;  %v4166_v29 = vadd.f32 %v440_v28, %v378_v25 }
 0x1ce   :  { %3384 = vtanh.f32 %v4164_v26 }
 0x1cf   :  { %v438_v32 = vpop.permute.xlu1 %437  ;;  %3386 = vtanh.f32 %v4166_v29 }
 0x1d0   :  { %v4172_v37 = vadd.f32 %v438_v32, %v377_v30 }
 0x1d2   :  { %v442_v38 = vpop.permute.xlu0 %441  ;;  %3388 = vtanh.f32 %v4172_v37 }
 0x1d3   :  { %v3379_v34 = vpop.eup %3378  ;;  %v4177_v44 = vadd.f32 %v442_v38, %v379_v36  ;;  %v444_v45 = vpop.permute.xlu1 %443 }
 0x1d4   :  { %477 = vrot.lane.b32.xlu0 %v3379_v34, %s3913_s5  ;;  %v4179_v49 = vadd.f32 %v444_v45, %v380_v41 }
 0x1d5   :  { %3390 = vtanh.f32 %v4177_v44 }
 0x1d6   :  { %3392 = vtanh.f32 %v4179_v49 }
 0x1d7   :  { %v3381_v47 = vpop.eup %3380 }
 0x1d8   :  { %v3383_v50 = vpop.eup %3382  ;;  %483 = vrot.lane.b32.xlu1 %v3381_v47, %s3913_s5 }
 0x1d9   :  { %479 = vrot.lane.b32.xlu0 %v3383_v50, %s3913_s5 }
 0x1db   :  { %v3385_v52 = vpop.eup %3384 }
 0x1dc   :  { %481 = vrot.lane.b32.xlu1 %v3385_v52, %s3913_s5  ;;  %v3387_v53 = vpop.eup %3386 }
 0x1df   :  { %v3389_v54 = vpop.eup %3388 }
 0x1e0   :  { %487 = vrot.lane.b32.xlu1 %v3387_v53, %s3913_s5  ;;  %485 = vrot.lane.b32.xlu0 %v3389_v54, %s3913_s5 }
 0x1e2   :  { %v3391_v56 = vpop.eup %3390 }
 0x1e3   :  { %v3393_v58 = vpop.eup %3392 }
 0x1e4   :  { %491 = vrot.lane.b32.xlu1 %v3393_v58, %s3913_s5  ;;  %489 = vrot.lane.b32.xlu0 %v3391_v56, %s3913_s5 }
 0x246   :  { %v478_v59 = vpop.permute.xlu0 %477 }
 0x247   :  { %v501_v7 = vmul.f32 %v4118_v33, %v478_v59 }
 0x24a   :  { %v484_v60 = vpop.permute.xlu1 %483 }
 0x24b   :  { %v480_v62 = vpop.permute.xlu0 %479  ;;  %v504_v10 = vmul.f32 %v4122_v40, %v484_v60 }
 0x24c   :  { %v502_v63 = vmul.f32 %v4124_v42, %v480_v62 }
 0x24e   :  { %v482_v0 = vpop.permute.xlu1 %481  ;;  %v517_v4 = vrot.slane %v502_v63, 7 }
 0x24f   :  { %v503_v2 = vmul.f32 %v4130_v48, %v482_v0  ;;  %v523_v48 = vrot.slane %v504_v10, 5 }
 0x250   :  { %v519_v12 = vsel %vm518_vm3, %v517_v4, %v501_v7 }
 0x251   :  { %v520_v6 = vrot.slane %v503_v2, 6 }
 0x252   :  { %v488_v11 = vpop.permute.xlu1 %487  ;;  %v486_v15 = vpop.permute.xlu0 %485 }
 0x253   :  { %v506_v13 = vmul.f32 %v4133_v51, %v488_v11  ;;  %v522_v16 = vsel %vm521_vm4, %v520_v6, %v519_v12  ;;  %v505_v42 = vmul.f32 %v4138_v55, %v486_v15 }
 0x254   :  { %v525_v33 = vsel %vm524_vm5, %v523_v48, %v522_v16 }
 0x255   :  { %v526_v17 = vrot.slane %v505_v42, 4  ;;  %v529_v20 = vrot.slane %v506_v13, 3 }
 0x256   :  { %v492_v23 = vpop.permute.xlu1 %491  ;;  %v490_v40 = vpop.permute.xlu0 %489 }
 0x257   :  { %v528_v24 = vsel %vm527_vm6, %v526_v17, %v525_v33  ;;  %v508_v25 = vmul.f32 %v4145_v61, %v492_v23  ;;  %v507_v51 = vmul.f32 %v4141_v57, %v490_v40 }
 0x258   :  { %v531_v55 = vsel %vm530_vm7, %v529_v20, %v528_v24 }
 0x259   :  { %v535_v28 = vrot.slane %v508_v25, 1  ;;  %v532_v30 = vrot.slane %v507_v51, 2 }
 0x25b   :  { %v534_v32 = vsel %vm533_vm8, %v532_v30, %v531_v55 }
 0x25c   :  { %v537_v34 = vsel %vm536_vm9, %v535_v28, %v534_v32 }
 0x25d   :  { %538 = vrot.lane.b32.xlu0 %v537_v34, %s3914_s24 }
 0x2cf   :  { %v539_v36 = vpop.permute.xlu0 %538 }
 0x2d0   :  { %3243 = vmatmul.mubr.msk.f32.vlgmr.msra.gmra.mxu1 %vm187_vm2, %v539_v36 }
 0x2d1   :  { %3257 = vmatpush3.msra.mxu1 %v3980_v1  ;;  %3264 = vmatprep.mubr.msk.f32.mxu1 %vm3912_vm1, %v3911_v3 }
 0x2d2   :  { %3258 = vmatprep.subr.mxu1 %v3911_v3 }
 0x2d3   :  { %3259 = vmatpush3.msra.mxu1 %v3993_v5 }
 0x2d4   :  { %3260 = vmatprep.subr.mxu1 %v3911_v3 }
 0x2d5   :  { %3261 = vmatpush3.msra.mxu1 %v4006_v8 }
 0x2d6   :  { %3262 = vmatprep.subr.mxu1 %v3911_v3 }
 0x2d7   :  { %3263 = vmatpush3.msra.mxu1 %v4015_v9 }
 0x2d8   :  { %3278 = vmatprep.subr.mxu1 %v3911_v3 }
 0x390   :  { %v608_v57 = vpop.f32.mrf.mxu1 }
 0x391   :  { %v614_v1 = vrot.slane %v608_v57, 1  ;;  %v613_v38 = vrot.slane %v608_v57, 7  ;;  %v629_v41 = vadd.f32 %v608_v57, %v4078_v27  ;;  %v615_v45 = vrot.slane %v608_v57, 2 }
 0x392   :  { %v3244_v61 = vpop.f32.mrf.mxu1  ;;  %v616_v50 = vrot.slane %v608_v57, 3  ;;  %v617_v53 = vrot.slane %v608_v57, 4  ;;  %v618_v56 = vrot.slane %v608_v57, 5  ;;  %v619_v59 = vrot.slane %v608_v57, 6 }
 0x393   :  { %v630_v47 = vadd.f32 %v614_v1, %v4082_v31  ;;  %v628_v52 = vadd.f32 %v613_v38, %v4071_v19  ;;  %3394 = vtanh.f32 %v629_v41  ;;  %v631_v54 = vadd.f32 %v615_v45, %v4073_v21 }
 0x394   :  { %v632_v58 = vadd.f32 %v616_v50, %v4088_v39  ;;  %v633_v60 = vadd.f32 %v617_v53, %v4085_v35  ;;  %v634_v62 = vadd.f32 %v618_v56, %v4094_v46  ;;  %v635_v63 = vadd.f32 %v619_v59, %v4091_v43 }
 0x395   :  { %3396 = vtanh.f32 %v630_v47  ;;  %v3089_v13 = vmul.f32 -1.442695, %v629_v41  ;;  %v3090_v15 = vmul.f32 -1.442695, %v630_v47  ;;  %v3088_v16 = vmul.f32 -1.442695, %v628_v52 }
 0x396   :  { %3398 = vtanh.f32 %v628_v52  ;;  %v3091_v42 = vmul.f32 -1.442695, %v631_v54  ;;  %v3092_v48 = vmul.f32 -1.442695, %v632_v58  ;;  %v3093_v17 = vmul.f32 -1.442695, %v633_v60 }
 0x397   :  { %3400 = vtanh.f32 %v631_v54  ;;  %v3094_v20 = vmul.f32 -1.442695, %v634_v62  ;;  %v3095_v33 = vmul.f32 -1.442695, %v635_v63 }
 0x398   :  { %3402 = vtanh.f32 %v632_v58 }
 0x399   :  { %3404 = vtanh.f32 %v633_v60 }
 0x39a   :  { %3406 = vtanh.f32 %v634_v62 }
 0x39b   :  { %3408 = vtanh.f32 %v635_v63 }
 0x39c   :  { %3410 = vpow2.f32 %v3089_v13 }
 0x39d   :  { %3412 = vpow2.f32 %v3090_v15 }
 0x39e   :  { %3414 = vpow2.f32 %v3088_v16 }
 0x39f   :  { %3416 = vpow2.f32 %v3091_v42 }
 0x3a0   :  { %v3395_v0 = vpop.eup %3394  ;;  %3418 = vpow2.f32 %v3092_v48  ;;  %v701_v48 = vrot.slane %v4158_v22, 7 }
 0x3a1   :  { %734 = vrot.lane.b32.xlu1 %v3395_v0, %s3913_s5  ;;  %3420 = vpow2.f32 %v3093_v17  ;;  %v702_v17 = vrot.slane %v4164_v26, 7 }
 0x3a2   :  { %v3397_v2 = vpop.eup %3396  ;;  %3422 = vpow2.f32 %v3094_v20 }
 0x3a3   :  { %736 = vrot.lane.b32.xlu0 %v3397_v2, %s3913_s5  ;;  %v3399_v4 = vpop.eup %3398  ;;  %3424 = vpow2.f32 %v3095_v33 }
 0x3a4   :  { %v3401_v6 = vpop.eup %3400 }
 0x3a5   :  { %732 = vrot.lane.b32.xlu1 %v3399_v4, %s3913_s5  ;;  %v3403_v7 = vpop.eup %3402 }
 0x3a6   :  { %v3405_v10 = vpop.eup %3404 }
 0x3a7   :  { %738 = vrot.lane.b32.xlu0 %v3401_v6, %s3913_s5  ;;  %v3407_v11 = vpop.eup %3406 }
 0x3a8   :  { %v3409_v12 = vpop.eup %3408 }
 0x3a9   :  { %740 = vrot.lane.b32.xlu1 %v3403_v7, %s3913_s5  ;;  %v3411_v23 = vpop.eup %3410 }
 0x3aa   :  { %v3413_v40 = vpop.eup %3412  ;;  %v661_v24 = vadd.f32 1.0, %v3411_v23 }
 0x3ab   :  { %742 = vrot.lane.b32.xlu0 %v3405_v10, %s3913_s5  ;;  %v3415_v25 = vpop.eup %3414  ;;  %v662_v51 = vadd.f32 1.0, %v3413_v40  ;;  %v700_v40 = vrot.slane %v4151_v14, 7 }
 0x3ac   :  { %v3417_v28 = vpop.eup %3416  ;;  %v660_v30 = vadd.f32 1.0, %v3415_v25  ;;  %3426 = vrcp.f32 %v661_v24 }
 0x3ad   :  { %744 = vrot.lane.b32.xlu1 %v3407_v11, %s3913_s5  ;;  %v3419_v55 = vpop.eup %3418  ;;  %v663_v32 = vadd.f32 1.0, %v3417_v28  ;;  %3428 = vrcp.f32 %v662_v51  ;;  %v703_v51 = vrot.slane %v4156_v18, 7 }
 0x3ae   :  { %v3421_v34 = vpop.eup %3420  ;;  %v664_v36 = vadd.f32 1.0, %v3419_v55  ;;  %3430 = vrcp.f32 %v660_v30  ;;  %v704_v55 = vrot.slane %v4172_v37, 7 }
 0x3af   :  { %746 = vrot.lane.b32.xlu0 %v3409_v12, %s3913_s5  ;;  %v3423_v57 = vpop.eup %3422  ;;  %v665_v61 = vadd.f32 1.0, %v3421_v34  ;;  %3432 = vrcp.f32 %v663_v32  ;;  %v705_v34 = vrot.slane %v4166_v29, 7 }
 0x3b0   :  { %v3425_v1 = vpop.eup %3424  ;;  %v666_v38 = vadd.f32 1.0, %v3423_v57  ;;  %3434 = vrcp.f32 %v664_v36 }
 0x3b1   :  { %v667_v41 = vadd.f32 1.0, %v3425_v1  ;;  %3436 = vrcp.f32 %v665_v61  ;;  %v706_v1 = vrot.slane %v4177_v44, 7 }
 0x3b2   :  { %3438 = vrcp.f32 %v666_v38 }
 0x3b3   :  { %3440 = vrcp.f32 %v667_v41  ;;  %v707_v41 = vrot.slane %v4179_v49, 7 }
 0x3b9   :  { %v4233_v45 = vpop.eup %3426 }
 0x3ba   :  { %v4235_v50 = vpop.eup %3428  ;;  %v717_v20 = vmul.f32 %v4233_v45, %v701_v48 }
 0x3bb   :  { %v4240_v56 = vpop.eup %3430  ;;  %v718_v23 = vmul.f32 %v4235_v50, %v702_v17 }
 0x3bc   :  { %v4243_v59 = vpop.eup %3432  ;;  %v716_v22 = vmul.f32 %v4240_v56, %v700_v40 }
 0x3bd   :  { %v4248_v0 = vpop.eup %3434  ;;  %v719_v30 = vmul.f32 %v4243_v59, %v703_v51 }
 0x3be   :  { %v4251_v4 = vpop.eup %3436  ;;  %v720_v18 = vmul.f32 %v4248_v0, %v704_v55 }
 0x3bf   :  { %v4256_v11 = vpop.eup %3438  ;;  %v721_v61 = vmul.f32 %v4251_v4, %v705_v34 }
 0x3c0   :  { %v4259_v13 = vpop.eup %3440  ;;  %v722_v29 = vmul.f32 %v4256_v11, %v706_v1 }
 0x413   :  { %v735_v47 = vpop.permute.xlu1 %734 }
 0x414   :  { %v757_v52 = vmul.f32 %v4233_v45, %v735_v47 }
 0x415   :  { %v737_v53 = vpop.permute.xlu0 %736 }
 0x416   :  { %v758_v54 = vmul.f32 %v4235_v50, %v737_v53  ;;  %774 = vrot.lane.b32.xlu1 %v757_v52, %s3914_s24  ;;  %v723_v53 = vmul.f32 %v4259_v13, %v707_v41 }
 0x417   :  { %v733_v58 = vpop.permute.xlu1 %732 }
 0x418   :  { %776 = vrot.lane.b32.xlu0 %v758_v54, %s3914_s24  ;;  %v756_v60 = vmul.f32 %v4240_v56, %v733_v58 }
 0x419   :  { %v739_v62 = vpop.permute.xlu0 %738 }
 0x41a   :  { %v759_v63 = vmul.f32 %v4243_v59, %v739_v62  ;;  %772 = vrot.lane.b32.xlu1 %v756_v60, %s3914_s24 }
 0x41b   :  { %v741_v2 = vpop.permute.xlu1 %740 }
 0x41c   :  { %778 = vrot.lane.b32.xlu0 %v759_v63, %s3914_s24  ;;  %v760_v6 = vmul.f32 %v4248_v0, %v741_v2 }
 0x41d   :  { %v743_v7 = vpop.permute.xlu0 %742 }
 0x41e   :  { %v761_v10 = vmul.f32 %v4251_v4, %v743_v7  ;;  %780 = vrot.lane.b32.xlu1 %v760_v6, %s3914_s24 }
 0x41f   :  { %v745_v12 = vpop.permute.xlu1 %744 }
 0x420   :  { %782 = vrot.lane.b32.xlu0 %v761_v10, %s3914_s24  ;;  %v762_v15 = vmul.f32 %v4256_v11, %v745_v12 }
 0x421   :  { %v747_v16 = vpop.permute.xlu0 %746 }
 0x422   :  { %v763_v42 = vmul.f32 %v4259_v13, %v747_v16  ;;  %784 = vrot.lane.b32.xlu1 %v762_v15, %s3914_s24 }
 0x424   :  { %786 = vrot.lane.b32.xlu0 %v763_v42, %s3914_s24 }
 0x488   :  { %v775_v33 = vpop.permute.xlu1 %774 }
 0x489   :  { %v4270_v24 = vadd.f32 %v775_v33, %v717_v20 }
 0x48a   :  { %v777_v25 = vpop.permute.xlu0 %776 }
 0x48b   :  { %v4273_v28 = vadd.f32 %v777_v25, %v718_v23  ;;  %3442 = vtanh.f32 %v4270_v24 }
 0x48c   :  { %v773_v26 = vpop.permute.xlu1 %772 }
 0x48d   :  { %3444 = vtanh.f32 %v4273_v28  ;;  %v4280_v32 = vadd.f32 %v773_v26, %v716_v22 }
 0x48e   :  { %v779_v14 = vpop.permute.xlu0 %778 }
 0x48f   :  { %v4283_v36 = vadd.f32 %v779_v14, %v719_v30  ;;  %3446 = vtanh.f32 %v4280_v32 }
 0x490   :  { %v781_v57 = vpop.permute.xlu1 %780 }
 0x491   :  { %3448 = vtanh.f32 %v4283_v36  ;;  %v4290_v38 = vadd.f32 %v781_v57, %v720_v18 }
 0x492   :  { %v783_v37 = vpop.permute.xlu0 %782 }
 0x493   :  { %v4293_v47 = vadd.f32 %v783_v37, %v721_v61  ;;  %3450 = vtanh.f32 %v4290_v38 }
 0x494   :  { %v785_v52 = vpop.permute.xlu1 %784 }
 0x495   :  { %3452 = vtanh.f32 %v4293_v47  ;;  %v4299_v54 = vadd.f32 %v785_v52, %v722_v29 }
 0x496   :  { %v787_v58 = vpop.permute.xlu0 %786 }
 0x497   :  { %v4301_v44 = vadd.f32 %v787_v58, %v723_v53  ;;  %3454 = vtanh.f32 %v4299_v54 }
 0x498   :  { %v3443_v60 = vpop.eup %3442 }
 0x499   :  { %3456 = vtanh.f32 %v4301_v44  ;;  %822 = vrot.lane.b32.xlu1 %v3443_v60, %s3913_s5 }
 0x49a   :  { %v3445_v49 = vpop.eup %3444 }
 0x49b   :  { %824 = vrot.lane.b32.xlu0 %v3445_v49, %s3913_s5 }
 0x49c   :  { %v3447_v62 = vpop.eup %3446 }
 0x49d   :  { %820 = vrot.lane.b32.xlu1 %v3447_v62, %s3913_s5 }
 0x49e   :  { %v3449_v63 = vpop.eup %3448 }
 0x49f   :  { %826 = vrot.lane.b32.xlu0 %v3449_v63, %s3913_s5 }
 0x4a0   :  { %v3451_v2 = vpop.eup %3450 }
 0x4a1   :  { %828 = vrot.lane.b32.xlu1 %v3451_v2, %s3913_s5 }
 0x4a2   :  { %v3453_v6 = vpop.eup %3452 }
 0x4a3   :  { %830 = vrot.lane.b32.xlu0 %v3453_v6, %s3913_s5 }
 0x4a4   :  { %v3455_v7 = vpop.eup %3454 }
 0x4a5   :  { %832 = vrot.lane.b32.xlu1 %v3455_v7, %s3913_s5 }
 0x4a6   :  { %v3457_v10 = vpop.eup %3456 }
 0x4a7   :  { %834 = vrot.lane.b32.xlu0 %v3457_v10, %s3913_s5 }
 0x50b   :  { %v823_v12 = vpop.permute.xlu1 %822 }
 0x50c   :  { %v845_v33 = vmul.f32 %v4233_v45, %v823_v12 }
 0x50d   :  { %v825_v15 = vpop.permute.xlu0 %824 }
 0x50e   :  { %v846_v16 = vmul.f32 %v4235_v50, %v825_v15 }
 0x50f   :  { %v821_v42 = vpop.permute.xlu1 %820 }
 0x510   :  { %v844_v48 = vmul.f32 %v4240_v56, %v821_v42  ;;  %v862_v40 = vrot.slane %v846_v16, 7 }
 0x511   :  { %v827_v17 = vpop.permute.xlu0 %826 }
 0x512   :  { %v847_v20 = vmul.f32 %v4243_v59, %v827_v17  ;;  %v860_v23 = vrot.slane %v844_v48, 1 }
 0x513   :  { %v829_v51 = vpop.permute.xlu1 %828 }
 0x514   :  { %v864_v25 = vrot.slane %v847_v20, 6  ;;  %v861_v22 = vsel %vm518_vm3, %v845_v33, %v860_v23  ;;  %v848_v26 = vmul.f32 %v4248_v0, %v829_v51 }
 0x515   :  { %v831_v30 = vpop.permute.xlu0 %830  ;;  %v863_v55 = vsel %vm521_vm4, %v862_v40, %v861_v22 }
 0x516   :  { %v849_v50 = vmul.f32 %v4251_v4, %v831_v30  ;;  %v865_v56 = vsel %vm524_vm5, %v864_v25, %v863_v55  ;;  %v866_v14 = vrot.slane %v848_v26, 5 }
 0x517   :  { %v833_v59 = vpop.permute.xlu1 %832 }
 0x518   :  { %v868_v34 = vrot.slane %v849_v50, 4  ;;  %v867_v45 = vsel %vm527_vm6, %v866_v14, %v865_v56  ;;  %v850_v18 = vmul.f32 %v4256_v11, %v833_v59  ;;  %v4333_v11 = vld [vmem:[%s5102_s4 + $0x18] sm:$0xff] }
 0x519   :  { %v835_v57 = vpop.permute.xlu0 %834 }
 0x51a   :  { %v851_v61 = vmul.f32 %v4259_v13, %v835_v57  ;;  %v869_v1 = vsel %vm530_vm7, %v868_v34, %v867_v45  ;;  %v870_v0 = vrot.slane %v850_v18, 3 }
 0x51c   :  { %v872_v37 = vrot.slane %v851_v61, 2  ;;  %v871_v41 = vsel %vm533_vm8, %v870_v0, %v869_v1 }
 0x51e   :  { %v873_v4 = vsel %vm536_vm9, %v872_v37, %v871_v41 }
 0x51f   :  { %874 = vrot.lane.b32.xlu1 %v873_v4, %s3914_s24 }
 0x591   :  { %v875_v29 = vpop.permute.xlu1 %874 }
 0x592   :  { %3254 = vmatmul.mubr.msk.f32.vlgmr.msra.gmra.mxu0 %vm187_vm2, %v875_v29 }
 0x593   :  { %3268 = vmatpush3.msra.mxu0 %v4333_v11  ;;  %3275 = vmatprep.mubr.msk.f32.mxu0 %vm3912_vm1, %v3911_v3 }
 0x594   :  { %3269 = vmatprep.subr.mxu0 %v3911_v3 }
 0x595   :  { %3270 = vmatpush3.msra.mxu0 %v3993_v5 }
 0x596   :  { %3271 = vmatprep.subr.mxu0 %v3911_v3 }
 0x597   :  { %3272 = vmatpush3.msra.mxu0 %v4006_v8 }
 0x598   :  { %3273 = vmatprep.subr.mxu0 %v3911_v3 }
 0x599   :  { %3274 = vmatpush3.msra.mxu0 %v4015_v9 }
 0x59a   :  { %3289 = vmatprep.subr.mxu0 %v3911_v3 }
 0x652   :  { %v944_v13 = vpop.f32.mrf.mxu0 }
 0x653   :  { %v949_v52 = vrot.slane %v944_v13, 6  ;;  %v951_v60 = vrot.slane %v944_v13, 1  ;;  %v950_v49 = vrot.slane %v944_v13, 7  ;;  %v966_v5 = vadd.f32 %v944_v13, %v4082_v31 }
 0x654   :  { %v3255_v53 = vpop.f32.mrf.mxu0  ;;  %v952_v62 = vrot.slane %v944_v13, 2  ;;  %v953_v8 = vrot.slane %v944_v13, 3  ;;  %v954_v9 = vrot.slane %v944_v13, 4  ;;  %v955_v10 = vrot.slane %v944_v13, 5 }
 0x655   :  { %v964_v58 = vadd.f32 %v949_v52, %v4071_v19  ;;  %v967_v63 = vadd.f32 %v951_v60, %v4073_v21  ;;  %v965_v2 = vadd.f32 %v950_v49, %v4078_v27  ;;  %v3099_v51 = vmul.f32 -1.442695, %v966_v5 }
 0x656   :  { %v968_v6 = vadd.f32 %v952_v62, %v4088_v39  ;;  %v969_v12 = vadd.f32 %v953_v8, %v4085_v35  ;;  %v970_v15 = vadd.f32 %v954_v9, %v4094_v46  ;;  %v971_v16 = vadd.f32 %v955_v10, %v4091_v43 }
 0x657   :  { %3458 = vtanh.f32 %v964_v58  ;;  %v3097_v25 = vmul.f32 -1.442695, %v964_v58  ;;  %v3100_v22 = vmul.f32 -1.442695, %v967_v63  ;;  %v3098_v26 = vmul.f32 -1.442695, %v965_v2 }
 0x658   :  { %3460 = vtanh.f32 %v966_v5  ;;  %v3101_v30 = vmul.f32 -1.442695, %v968_v6  ;;  %v3102_v50 = vmul.f32 -1.442695, %v969_v12  ;;  %v3103_v56 = vmul.f32 -1.442695, %v970_v15 }
 0x659   :  { %3462 = vtanh.f32 %v967_v63  ;;  %v3104_v34 = vmul.f32 -1.442695, %v971_v16 }
 0x65a   :  { %3464 = vtanh.f32 %v965_v2 }
 0x65b   :  { %3466 = vtanh.f32 %v968_v6 }
 0x65c   :  { %3468 = vtanh.f32 %v969_v12 }
 0x65d   :  { %3470 = vtanh.f32 %v970_v15 }
 0x65e   :  { %3472 = vtanh.f32 %v971_v16 }
 0x65f   :  { %3474 = vpow2.f32 %v3097_v25 }
 0x660   :  { %3476 = vpow2.f32 %v3099_v51 }
 0x661   :  { %3478 = vpow2.f32 %v3100_v22  ;;  %v1036_v22 = vrot.slane %v4280_v32, 7 }
 0x662   :  { %3480 = vpow2.f32 %v3098_v26 }
 0x663   :  { %3482 = vpow2.f32 %v3101_v30 }
 0x664   :  { %v3459_v7 = vpop.eup %3458  ;;  %3484 = vpow2.f32 %v3102_v50  ;;  %v1038_v50 = vrot.slane %v4273_v28, 7 }
 0x665   :  { %1068 = vrot.lane.b32.xlu0 %v3459_v7, %s3913_s5  ;;  %v3461_v42 = vpop.eup %3460  ;;  %3486 = vpow2.f32 %v3103_v56  ;;  %v1039_v56 = vrot.slane %v4283_v36, 7 }
 0x666   :  { %v3463_v48 = vpop.eup %3462  ;;  %1072 = vrot.lane.b32.xlu1 %v3461_v42, %s3913_s5 }
 0x667   :  { %v3465_v17 = vpop.eup %3464 }
 0x668   :  { %v3467_v20 = vpop.eup %3466 }
 0x669   :  { %1074 = vrot.lane.b32.xlu0 %v3463_v48, %s3913_s5  ;;  %v3469_v33 = vpop.eup %3468 }
 0x66a   :  { %1070 = vrot.lane.b32.xlu1 %v3465_v17, %s3913_s5  ;;  %v3471_v23 = vpop.eup %3470 }
 0x66b   :  { %v3473_v40 = vpop.eup %3472 }
 0x66c   :  { %v3475_v55 = vpop.eup %3474 }
 0x66d   :  { %1076 = vrot.lane.b32.xlu0 %v3467_v20, %s3913_s5  ;;  %v996_v14 = vadd.f32 1.0, %v3475_v55  ;;  %v3477_v59 = vpop.eup %3476 }
 0x66e   :  { %1078 = vrot.lane.b32.xlu1 %v3469_v33, %s3913_s5  ;;  %v3479_v45 = vpop.eup %3478  ;;  %v998_v18 = vadd.f32 1.0, %v3477_v59 }
 0x66f   :  { %3488 = vrcp.f32 %v996_v14  ;;  %v3481_v57 = vpop.eup %3480  ;;  %v999_v61 = vadd.f32 1.0, %v3479_v45  ;;  %v1037_v45 = vrot.slane %v4270_v24, 7 }
 0x670   :  { %3490 = vpow2.f32 %v3104_v34  ;;  %v3483_v1 = vpop.eup %3482  ;;  %v997_v0 = vadd.f32 1.0, %v3481_v57  ;;  %v1040_v57 = vrot.slane %v4290_v38, 7 }
 0x671   :  { %1080 = vrot.lane.b32.xlu0 %v3471_v23, %s3913_s5  ;;  %3492 = vrcp.f32 %v998_v18  ;;  %v3485_v37 = vpop.eup %3484  ;;  %v1000_v41 = vadd.f32 1.0, %v3483_v1 }
 0x672   :  { %1082 = vrot.lane.b32.xlu1 %v3473_v40, %s3913_s5  ;;  %3494 = vrcp.f32 %v999_v61  ;;  %v3487_v4 = vpop.eup %3486  ;;  %v1001_v52 = vadd.f32 1.0, %v3485_v37 }
 0x673   :  { %3496 = vrcp.f32 %v997_v0  ;;  %v1002_v60 = vadd.f32 1.0, %v3487_v4  ;;  %v1041_v0 = vrot.slane %v4293_v47, 7  ;;  %v1042_v4 = vrot.slane %v4299_v54, 7 }
 0x674   :  { %3498 = vrcp.f32 %v1000_v41  ;;  %v1043_v47 = vrot.slane %v4301_v44, 7 }
 0x675   :  { %3500 = vrcp.f32 %v1001_v52 }
 0x676   :  { %3502 = vrcp.f32 %v1002_v60 }
 0x67c   :  { %v4361_v29 = vpop.eup %3488 }
 0x67d   :  { %v3491_v58 = vpop.eup %3490  ;;  %v1052_v26 = vmul.f32 %v4361_v29, %v1036_v22 }
 0x67e   :  { %v1003_v49 = vadd.f32 1.0, %v3491_v58  ;;  %v4365_v5 = vpop.eup %3492 }
 0x67f   :  { %v4367_v63 = vpop.eup %3494  ;;  %v1054_v14 = vmul.f32 %v4365_v5, %v1038_v50 }
 0x680   :  { %3504 = vrcp.f32 %v1003_v49  ;;  %v4372_v6 = vpop.eup %3496  ;;  %v1055_v59 = vmul.f32 %v4367_v63, %v1039_v56 }
 0x681   :  { %v4375_v10 = vpop.eup %3498  ;;  %v1053_v28 = vmul.f32 %v4372_v6, %v1037_v45 }
 0x682   :  { %v4380_v42 = vpop.eup %3500  ;;  %v1056_v36 = vmul.f32 %v4375_v10, %v1040_v57 }
 0x683   :  { %v4383_v17 = vpop.eup %3502 }
 0x68d   :  { %v4388_v40 = vpop.eup %3504 }
 0x68e   :  { %v1059_v54 = vmul.f32 %v4388_v40, %v1043_v47 }
 0x6d7   :  { %v1069_v13 = vpop.permute.xlu0 %1068 }
 0x6d8   :  { %v1092_v53 = vmul.f32 %v4361_v29, %v1069_v13  ;;  %v1073_v62 = vpop.permute.xlu1 %1072  ;;  %v1057_v13 = vmul.f32 %v4380_v42, %v1041_v0 }
 0x6d9   :  { %v1094_v8 = vmul.f32 %v4365_v5, %v1073_v62 }
 0x6da   :  { %1108 = vrot.lane.b32.xlu0 %v1092_v53, %s3914_s24  ;;  %v1058_v53 = vmul.f32 %v4383_v17, %v1042_v4 }
 0x6db   :  { %v1075_v2 = vpop.permute.xlu0 %1074  ;;  %1112 = vrot.lane.b32.xlu1 %v1094_v8, %s3914_s24 }
 0x6dc   :  { %v1095_v9 = vmul.f32 %v4367_v63, %v1075_v2  ;;  %v1071_v7 = vpop.permute.xlu1 %1070 }
 0x6dd   :  { %v1093_v12 = vmul.f32 %v4372_v6, %v1071_v7 }
 0x6de   :  { %1114 = vrot.lane.b32.xlu0 %v1095_v9, %s3914_s24 }
 0x6df   :  { %v1077_v15 = vpop.permute.xlu0 %1076  ;;  %1110 = vrot.lane.b32.xlu1 %v1093_v12, %s3914_s24 }
 0x6e0   :  { %v1096_v16 = vmul.f32 %v4375_v10, %v1077_v15  ;;  %v1079_v48 = vpop.permute.xlu1 %1078 }
 0x6e1   :  { %v1097_v20 = vmul.f32 %v4380_v42, %v1079_v48 }
 0x6e2   :  { %1116 = vrot.lane.b32.xlu0 %v1096_v16, %s3914_s24 }
 0x6e3   :  { %v1081_v33 = vpop.permute.xlu0 %1080  ;;  %1118 = vrot.lane.b32.xlu1 %v1097_v20, %s3914_s24 }
 0x6e4   :  { %v1098_v23 = vmul.f32 %v4383_v17, %v1081_v33  ;;  %v1083_v25 = vpop.permute.xlu1 %1082 }
 0x6e5   :  { %v1099_v51 = vmul.f32 %v4388_v40, %v1083_v25 }
 0x6e6   :  { %1120 = vrot.lane.b32.xlu0 %v1098_v23, %s3914_s24 }
 0x6e7   :  { %1122 = vrot.lane.b32.xlu1 %v1099_v51, %s3914_s24 }
 0x74c   :  { %v1109_v30 = vpop.permute.xlu0 %1108 }
 0x74d   :  { %v4395_v55 = vadd.f32 %v1109_v30, %v1052_v26  ;;  %v1113_v34 = vpop.permute.xlu1 %1112 }
 0x74e   :  { %v4403_v18 = vadd.f32 %v1113_v34, %v1054_v14 }
 0x74f   :  { %3506 = vtanh.f32 %v4395_v55 }
 0x750   :  { %v1115_v32 = vpop.permute.xlu0 %1114  ;;  %3508 = vtanh.f32 %v4403_v18 }
 0x751   :  { %v4406_v61 = vadd.f32 %v1115_v32, %v1055_v59  ;;  %v1111_v1 = vpop.permute.xlu1 %1110 }
 0x752   :  { %v4413_v37 = vadd.f32 %v1111_v1, %v1053_v28 }
 0x753   :  { %3510 = vtanh.f32 %v4406_v61 }
 0x754   :  { %v1117_v24 = vpop.permute.xlu0 %1116  ;;  %3512 = vtanh.f32 %v4413_v37 }
 0x755   :  { %v4416_v38 = vadd.f32 %v1117_v24, %v1056_v36  ;;  %v1119_v52 = vpop.permute.xlu1 %1118 }
 0x756   :  { %v4424_v58 = vadd.f32 %v1119_v52, %v1057_v13  ;;  %v4479_v52 = vld [vmem:[%s5102_s4] sm:$0xff] }
 0x757   :  { %3514 = vtanh.f32 %v4416_v38 }
 0x758   :  { %v1121_v60 = vpop.permute.xlu0 %1120  ;;  %3516 = vtanh.f32 %v4424_v58 }
 0x759   :  { %v4426_v49 = vadd.f32 %v1121_v60, %v1058_v53  ;;  %v1123_v62 = vpop.permute.xlu1 %1122 }
 0x75a   :  { %v4431_v8 = vadd.f32 %v1123_v62, %v1059_v54 }
 0x75b   :  { %3518 = vtanh.f32 %v4426_v49 }
 0x75c   :  { %v3507_v41 = vpop.eup %3506  ;;  %3520 = vtanh.f32 %v4431_v8 }
 0x75d   :  { %1156 = vrot.lane.b32.xlu0 %v3507_v41, %s3913_s5  ;;  %v3509_v2 = vpop.eup %3508 }
 0x75e   :  { %1160 = vrot.lane.b32.xlu1 %v3509_v2, %s3913_s5 }
 0x760   :  { %v3511_v9 = vpop.eup %3510 }
 0x761   :  { %1162 = vrot.lane.b32.xlu0 %v3511_v9, %s3913_s5  ;;  %v3513_v44 = vpop.eup %3512 }
 0x762   :  { %1158 = vrot.lane.b32.xlu1 %v3513_v44, %s3913_s5 }
 0x764   :  { %v3515_v7 = vpop.eup %3514 }
 0x765   :  { %1164 = vrot.lane.b32.xlu0 %v3515_v7, %s3913_s5  ;;  %v3517_v12 = vpop.eup %3516 }
 0x766   :  { %1166 = vrot.lane.b32.xlu1 %v3517_v12, %s3913_s5 }
 0x768   :  { %v3519_v15 = vpop.eup %3518 }
 0x769   :  { %1168 = vrot.lane.b32.xlu0 %v3519_v15, %s3913_s5  ;;  %v3521_v16 = vpop.eup %3520 }
 0x76a   :  { %1170 = vrot.lane.b32.xlu1 %v3521_v16, %s3913_s5 }
 0x7cf   :  { %v1157_v48 = vpop.permute.xlu0 %1156 }
 0x7d0   :  { %v1161_v20 = vpop.permute.xlu1 %1160  ;;  %v1180_v23 = vmul.f32 %v4361_v29, %v1157_v48 }
 0x7d1   :  { %v1182_v34 = vmul.f32 %v4365_v5, %v1161_v20 }
 0x7d2   :  { %v1196_v50 = vrot.slane %v1180_v23, 2 }
 0x7d3   :  { %v1163_v33 = vpop.permute.xlu0 %1162 }
 0x7d4   :  { %v1183_v25 = vmul.f32 %v4367_v63, %v1163_v33  ;;  %v1159_v51 = vpop.permute.xlu1 %1158 }
 0x7d5   :  { %v1181_v22 = vmul.f32 %v4372_v6, %v1159_v51 }
 0x7d6   :  { %v1200_v14 = vrot.slane %v1183_v25, 7 }
 0x7d7   :  { %v1165_v26 = vpop.permute.xlu0 %1164  ;;  %v1197_v56 = vrot.slane %v1181_v22, 1 }
 0x7d8   :  { %v1184_v30 = vmul.f32 %v4375_v10, %v1165_v26  ;;  %v1167_v59 = vpop.permute.xlu1 %1166 }
 0x7d9   :  { %v1198_v32 = vsel %vm518_vm3, %v1197_v56, %v1196_v50  ;;  %v1185_v57 = vmul.f32 %v4380_v42, %v1167_v59 }
 0x7da   :  { %v1202_v45 = vrot.slane %v1184_v30, 6  ;;  %v1199_v63 = vsel %vm521_vm4, %v1182_v34, %v1198_v32 }
 0x7db   :  { %v1169_v29 = vpop.permute.xlu0 %1168  ;;  %v1201_v6 = vsel %vm524_vm5, %v1200_v14, %v1199_v63  ;;  %v1204_v1 = vrot.slane %v1185_v57, 5 }
 0x7dc   :  { %v1186_v28 = vmul.f32 %v4383_v17, %v1169_v29  ;;  %v1203_v10 = vsel %vm527_vm6, %v1202_v45, %v1201_v6  ;;  %v1171_v36 = vpop.permute.xlu1 %1170  ;;  %v4465_v17 = vld [vmem:[%s5102_s4 + $0x10] sm:$0xff] }
 0x7dd   :  { %v1187_v5 = vmul.f32 %v4388_v40, %v1171_v36  ;;  %v1205_v24 = vsel %vm530_vm7, %v1204_v1, %v1203_v10  ;;  %v4472_v40 = vld [vmem:[%s5102_s4 + $0x8] sm:$0xff] }
 0x7de   :  { %v1206_v0 = vrot.slane %v1186_v28, 4 }
 0x7df   :  { %v1208_v4 = vrot.slane %v1187_v5, 3 }
 0x7e0   :  { %v1207_v41 = vsel %vm533_vm8, %v1206_v0, %v1205_v24 }
 0x7e1   :  { %v1209_v42 = vsel %vm536_vm9, %v1208_v4, %v1207_v41 }
 0x7e2   :  { %1210 = vrot.lane.b32.xlu0 %v1209_v42, %s3914_s24 }
 0x854   :  { %v1211_v13 = vpop.permute.xlu0 %1210 }
 0x855   :  { %3265 = vmatmul.mubr.msk.f32.vlgmr.msra.gmra.mxu1 %vm187_vm2, %v1211_v13 }
 0x856   :  { %3279 = vmatpush3.msra.mxu1 %v4333_v11  ;;  %3286 = vmatprep.mubr.msk.f32.mxu1 %vm3912_vm1, %v3911_v3 }
 0x857   :  { %3280 = vmatprep.subr.mxu1 %v3911_v3 }
 0x858   :  { %3281 = vmatpush3.msra.mxu1 %v4465_v17 }
 0x859   :  { %3282 = vmatprep.subr.mxu1 %v3911_v3 }
 0x85a   :  { %3283 = vmatpush3.msra.mxu1 %v4472_v40 }
 0x85b   :  { %3284 = vmatprep.subr.mxu1 %v3911_v3 }
 0x85c   :  { %3285 = vmatpush3.msra.mxu1 %v4479_v52 }
 0x85d   :  { %3300 = vmatprep.subr.mxu1 %v3911_v3 }
 0x915   :  { %v1280_v53 = vpop.f32.mrf.mxu1 }
 0x916   :  { %v1286_v60 = vrot.slane %v1280_v53, 6  ;;  %v1288_v54 = vrot.slane %v1280_v53, 1  ;;  %v1285_v2 = vrot.slane %v1280_v53, 5  ;;  %v1303_v9 = vadd.f32 %v1280_v53, %v4073_v21 }
 0x917   :  { %v3266_v47 = vpop.f32.mrf.mxu1  ;;  %v1289_v44 = vrot.slane %v1280_v53, 2  ;;  %v1287_v12 = vrot.slane %v1280_v53, 7  ;;  %v1291_v16 = vrot.slane %v1280_v53, 4  ;;  %v1290_v20 = vrot.slane %v1280_v53, 3 }
 0x918   :  { %v1301_v62 = vadd.f32 %v1286_v60, %v4078_v27  ;;  %v1304_v7 = vadd.f32 %v1288_v54, %v4088_v39  ;;  %v1300_v15 = vadd.f32 %v1285_v2, %v4071_v19  ;;  %v3109_v45 = vmul.f32 -1.442695, %v1303_v9 }
 0x919   :  { %v1305_v48 = vadd.f32 %v1289_v44, %v4085_v35  ;;  %v1302_v33 = vadd.f32 %v1287_v12, %v4082_v31  ;;  %v1307_v23 = vadd.f32 %v1291_v16, %v4091_v43  ;;  %v1306_v25 = vadd.f32 %v1290_v20, %v4094_v46 }
 0x91a   :  { %3522 = vtanh.f32 %v1301_v62  ;;  %v3107_v59 = vmul.f32 -1.442695, %v1301_v62  ;;  %v3110_v32 = vmul.f32 -1.442695, %v1304_v7  ;;  %v3106_v57 = vmul.f32 -1.442695, %v1300_v15 }
 0x91b   :  { %3524 = vtanh.f32 %v1303_v9  ;;  %v3111_v29 = vmul.f32 -1.442695, %v1305_v48  ;;  %v3108_v63 = vmul.f32 -1.442695, %v1302_v33  ;;  %v3113_v28 = vmul.f32 -1.442695, %v1307_v23 }
 0x91c   :  { %3526 = vtanh.f32 %v1304_v7  ;;  %v3112_v6 = vmul.f32 -1.442695, %v1306_v25 }
 0x91d   :  { %3528 = vtanh.f32 %v1300_v15 }
 0x91e   :  { %3530 = vtanh.f32 %v1305_v48 }
 0x91f   :  { %3532 = vtanh.f32 %v1302_v33 }
 0x920   :  { %3534 = vtanh.f32 %v1307_v23 }
 0x921   :  { %3536 = vtanh.f32 %v1306_v25 }
 0x922   :  { %3538 = vpow2.f32 %v3107_v59 }
 0x923   :  { %3540 = vpow2.f32 %v3109_v45 }
 0x924   :  { %3542 = vpow2.f32 %v3110_v32 }
 0x925   :  { %3544 = vpow2.f32 %v3106_v57 }
 0x926   :  { %3546 = vpow2.f32 %v3111_v29 }
 0x927   :  { %v3523_v51 = vpop.eup %3522  ;;  %3548 = vpow2.f32 %v3108_v63  ;;  %v1373_v63 = vrot.slane %v4413_v37, 7 }
 0x928   :  { %1406 = vrot.lane.b32.xlu0 %v3523_v51, %s3913_s5  ;;  %v3525_v22 = vpop.eup %3524  ;;  %3550 = vpow2.f32 %v3113_v28  ;;  %v1375_v28 = vrot.slane %v4406_v61, 7  ;;  %v1377_v61 = vrot.slane %v4424_v58, 7 }
 0x929   :  { %1410 = vrot.lane.b32.xlu1 %v3525_v22, %s3913_s5  ;;  %v3527_v26 = vpop.eup %3526  ;;  %3552 = vpow2.f32 %v3112_v6 }
 0x92a   :  { %v3529_v30 = vpop.eup %3528 }
 0x92b   :  { %v3531_v50 = vpop.eup %3530 }
 0x92c   :  { %1412 = vrot.lane.b32.xlu0 %v3527_v26, %s3913_s5  ;;  %v3533_v56 = vpop.eup %3532 }
 0x92d   :  { %1404 = vrot.lane.b32.xlu1 %v3529_v30, %s3913_s5  ;;  %v3535_v14 = vpop.eup %3534 }
 0x92e   :  { %v3537_v34 = vpop.eup %3536 }
 0x92f   :  { %v3539_v1 = vpop.eup %3538 }
 0x930   :  { %1414 = vrot.lane.b32.xlu0 %v3531_v50, %s3913_s5  ;;  %v3541_v10 = vpop.eup %3540  ;;  %v1333_v36 = vadd.f32 1.0, %v3539_v1 }
 0x931   :  { %1408 = vrot.lane.b32.xlu1 %v3533_v56, %s3913_s5  ;;  %v3543_v0 = vpop.eup %3542  ;;  %v1335_v5 = vadd.f32 1.0, %v3541_v10  ;;  %v1376_v10 = vrot.slane %v4416_v38, 7 }
 0x932   :  { %v3545_v24 = vpop.eup %3544  ;;  %v1336_v41 = vadd.f32 1.0, %v3543_v0  ;;  %3554 = vrcp.f32 %v1333_v36 }
 0x933   :  { %v3547_v4 = vpop.eup %3546  ;;  %v1332_v42 = vadd.f32 1.0, %v3545_v24  ;;  %3556 = vrcp.f32 %v1335_v5  ;;  %v1372_v24 = vrot.slane %v4395_v55, 7 }
 0x934   :  { %1418 = vrot.lane.b32.xlu0 %v3535_v14, %s3913_s5  ;;  %v3549_v13 = vpop.eup %3548  ;;  %v1337_v53 = vadd.f32 1.0, %v3547_v4  ;;  %3558 = vrcp.f32 %v1336_v41 }
 0x935   :  { %1416 = vrot.lane.b32.xlu1 %v3537_v34, %s3913_s5  ;;  %v3551_v47 = vpop.eup %3550  ;;  %v1334_v60 = vadd.f32 1.0, %v3549_v13  ;;  %3560 = vrcp.f32 %v1332_v42 }
 0x936   :  { %v3553_v54 = vpop.eup %3552  ;;  %v1339_v62 = vadd.f32 1.0, %v3551_v47  ;;  %3562 = vrcp.f32 %v1337_v53  ;;  %v1374_v53 = vrot.slane %v4403_v18, 7 }
 0x937   :  { %v1338_v2 = vadd.f32 1.0, %v3553_v54  ;;  %3564 = vrcp.f32 %v1334_v60  ;;  %v1379_v54 = vrot.slane %v4431_v8, 7 }
 0x938   :  { %3566 = vrcp.f32 %v1339_v62 }
 0x939   :  { %3568 = vrcp.f32 %v1338_v2 }
 0x93f   :  { %v4499_v9 = vpop.eup %3554 }
 0x940   :  { %v4502_v12 = vpop.eup %3556  ;;  %v1389_v6 = vmul.f32 %v4499_v9, %v1373_v63 }
 0x941   :  { %v4506_v48 = vpop.eup %3558  ;;  %v1391_v36 = vmul.f32 %v4502_v12, %v1375_v28 }
 0x942   :  { %v4510_v23 = vpop.eup %3560  ;;  %v1392_v37 = vmul.f32 %v4506_v48, %v1376_v10 }
 0x943   :  { %v4514_v22 = vpop.eup %3562  ;;  %v1388_v38 = vmul.f32 %v4510_v23, %v1372_v24 }
 0x944   :  { %v4518_v50 = vpop.eup %3564  ;;  %v1393_v55 = vmul.f32 %v4514_v22, %v1377_v61 }
 0x945   :  { %v4522_v34 = vpop.eup %3566  ;;  %v1390_v58 = vmul.f32 %v4518_v50, %v1374_v53 }
 0x946   :  { %v4526_v32 = vpop.eup %3568  ;;  %v1395_v18 = vmul.f32 %v4522_v34, %v1379_v54 }
 0x99a   :  { %v1407_v44 = vpop.permute.xlu0 %1406 }
 0x99b   :  { %v1429_v7 = vmul.f32 %v4499_v9, %v1407_v44  ;;  %v1411_v15 = vpop.permute.xlu1 %1410  ;;  %v1378_v44 = vrot.slane %v4426_v49, 7 }
 0x99c   :  { %v1431_v16 = vmul.f32 %v4502_v12, %v1411_v15 }
 0x99d   :  { %1446 = vrot.lane.b32.xlu0 %v1429_v7, %s3914_s24  ;;  %v1394_v8 = vmul.f32 %v4526_v32, %v1378_v44 }
 0x99e   :  { %v1413_v20 = vpop.permute.xlu0 %1412  ;;  %1450 = vrot.lane.b32.xlu1 %v1431_v16, %s3914_s24 }
 0x99f   :  { %v1432_v33 = vmul.f32 %v4506_v48, %v1413_v20  ;;  %v1405_v25 = vpop.permute.xlu1 %1404 }
 0x9a0   :  { %v1428_v51 = vmul.f32 %v4510_v23, %v1405_v25 }
 0x9a1   :  { %1452 = vrot.lane.b32.xlu0 %v1432_v33, %s3914_s24 }
 0x9a2   :  { %v1415_v26 = vpop.permute.xlu0 %1414  ;;  %1444 = vrot.lane.b32.xlu1 %v1428_v51, %s3914_s24 }
 0x9a3   :  { %v1433_v30 = vmul.f32 %v4514_v22, %v1415_v26  ;;  %v1409_v56 = vpop.permute.xlu1 %1408 }
 0x9a4   :  { %v1430_v14 = vmul.f32 %v4518_v50, %v1409_v56 }
 0x9a5   :  { %1454 = vrot.lane.b32.xlu0 %v1433_v30, %s3914_s24 }
 0x9a6   :  { %v1419_v59 = vpop.permute.xlu0 %1418  ;;  %1448 = vrot.lane.b32.xlu1 %v1430_v14, %s3914_s24 }
 0x9a7   :  { %v1435_v45 = vmul.f32 %v4522_v34, %v1419_v59  ;;  %v1417_v57 = vpop.permute.xlu1 %1416 }
 0x9a8   :  { %v1434_v29 = vmul.f32 %v4526_v32, %v1417_v57 }
 0x9a9   :  { %1458 = vrot.lane.b32.xlu0 %v1435_v45, %s3914_s24 }
 0x9aa   :  { %1456 = vrot.lane.b32.xlu1 %v1434_v29, %s3914_s24 }
 0xa0f   :  { %v1447_v1 = vpop.permute.xlu0 %1446 }
 0xa10   :  { %v4536_v0 = vadd.f32 %v1447_v1, %v1389_v6  ;;  %v1451_v5 = vpop.permute.xlu1 %1450 }
 0xa11   :  { %v4539_v41 = vadd.f32 %v1451_v5, %v1391_v36 }
 0xa12   :  { %3570 = vtanh.f32 %v4536_v0 }
 0xa13   :  { %v1453_v4 = vpop.permute.xlu0 %1452  ;;  %3572 = vtanh.f32 %v4539_v41 }
 0xa14   :  { %v4546_v42 = vadd.f32 %v1453_v4, %v1392_v37  ;;  %v1445_v13 = vpop.permute.xlu1 %1444 }
 0xa15   :  { %v4549_v47 = vadd.f32 %v1445_v13, %v1388_v38 }
 0xa16   :  { %3574 = vtanh.f32 %v4546_v42 }
 0xa17   :  { %v1455_v60 = vpop.permute.xlu0 %1454  ;;  %3576 = vtanh.f32 %v4549_v47 }
 0xa18   :  { %v4556_v62 = vadd.f32 %v1455_v60, %v1393_v55  ;;  %v1449_v2 = vpop.permute.xlu1 %1448 }
 0xa19   :  { %v4559_v7 = vadd.f32 %v1449_v2, %v1390_v58 }
 0xa1a   :  { %3578 = vtanh.f32 %v4556_v62 }
 0xa1b   :  { %v1459_v15 = vpop.permute.xlu0 %1458  ;;  %3580 = vtanh.f32 %v4559_v7 }
 0xa1c   :  { %v4565_v16 = vadd.f32 %v1459_v15, %v1395_v18  ;;  %v1457_v20 = vpop.permute.xlu1 %1456 }
 0xa1d   :  { %v4567_v33 = vadd.f32 %v1457_v20, %v1394_v8 }
 0xa1e   :  { %3582 = vtanh.f32 %v4565_v16 }
 0xa1f   :  { %v3571_v25 = vpop.eup %3570  ;;  %3584 = vtanh.f32 %v4567_v33 }
 0xa20   :  { %1494 = vrot.lane.b32.xlu0 %v3571_v25, %s3913_s5  ;;  %v3573_v49 = vpop.eup %3572 }
 0xa21   :  { %1498 = vrot.lane.b32.xlu1 %v3573_v49, %s3913_s5 }
 0xa23   :  { %v3575_v51 = vpop.eup %3574 }
 0xa24   :  { %1500 = vrot.lane.b32.xlu0 %v3575_v51, %s3913_s5  ;;  %v3577_v26 = vpop.eup %3576 }
 0xa25   :  { %1492 = vrot.lane.b32.xlu1 %v3577_v26, %s3913_s5 }
 0xa27   :  { %v3579_v30 = vpop.eup %3578 }
 0xa28   :  { %1502 = vrot.lane.b32.xlu0 %v3579_v30, %s3913_s5  ;;  %v3581_v56 = vpop.eup %3580 }
 0xa29   :  { %1496 = vrot.lane.b32.xlu1 %v3581_v56, %s3913_s5 }
 0xa2b   :  { %v3583_v14 = vpop.eup %3582 }
 0xa2c   :  { %1506 = vrot.lane.b32.xlu0 %v3583_v14, %s3913_s5  ;;  %v3585_v59 = vpop.eup %3584 }
 0xa2d   :  { %1504 = vrot.lane.b32.xlu1 %v3585_v59, %s3913_s5 }
 0xa92   :  { %v1495_v45 = vpop.permute.xlu0 %1494 }
 0xa93   :  { %v1499_v57 = vpop.permute.xlu1 %1498  ;;  %v1517_v6 = vmul.f32 %v4499_v9, %v1495_v45 }
 0xa94   :  { %v1519_v53 = vmul.f32 %v4502_v12, %v1499_v57 }
 0xa95   :  { %v1533_v4 = vrot.slane %v1517_v6, 2 }
 0xa96   :  { %v1501_v29 = vpop.permute.xlu0 %1500 }
 0xa97   :  { %v1493_v63 = vpop.permute.xlu1 %1492  ;;  %v1520_v24 = vmul.f32 %v4506_v48, %v1501_v29 }
 0xa98   :  { %v1516_v28 = vmul.f32 %v4510_v23, %v1493_v63 }
 0xa99   :  { %v1538_v60 = vrot.slane %v1520_v24, 7 }
 0xa9a   :  { %v1503_v1 = vpop.permute.xlu0 %1502  ;;  %v1532_v10 = vrot.slane %v1516_v28, 3 }
 0xa9b   :  { %v1497_v36 = vpop.permute.xlu1 %1496  ;;  %v1521_v5 = vmul.f32 %v4514_v22, %v1503_v1 }
 0xa9c   :  { %v1518_v37 = vmul.f32 %v4518_v50, %v1497_v36  ;;  %v1534_v23 = vsel %vm518_vm3, %v1533_v4, %v1532_v10 }
 0xa9d   :  { %v1540_v55 = vrot.slane %v1521_v5, 6 }
 0xa9e   :  { %v1507_v61 = vpop.permute.xlu0 %1506  ;;  %v1535_v38 = vrot.slane %v1518_v37, 1 }
 0xa9f   :  { %v1523_v13 = vmul.f32 %v4522_v34, %v1507_v61  ;;  %v1505_v9 = vpop.permute.xlu1 %1504 }
 0xaa0   :  { %v1536_v54 = vsel %vm521_vm4, %v1535_v38, %v1534_v23  ;;  %v1522_v22 = vmul.f32 %v4526_v32, %v1505_v9 }
 0xaa1   :  { %v1537_v48 = vsel %vm524_vm5, %v1519_v53, %v1536_v54  ;;  %v1544_v58 = vrot.slane %v1523_v13, 4 }
 0xaa2   :  { %v1539_v50 = vsel %vm527_vm6, %v1538_v60, %v1537_v48  ;;  %v1542_v2 = vrot.slane %v1522_v22, 5 }
 0xaa3   :  { %v1541_v44 = vsel %vm530_vm7, %v1540_v55, %v1539_v50 }
 0xaa4   :  { %v1543_v34 = vsel %vm533_vm8, %v1542_v2, %v1541_v44 }
 0xaa5   :  { %v1545_v12 = vsel %vm536_vm9, %v1544_v58, %v1543_v34 }
 0xaa6   :  { %1546 = vrot.lane.b32.xlu1 %v1545_v12, %s3914_s24 }
 0xb18   :  { %v1547_v18 = vpop.permute.xlu1 %1546 }
 0xb19   :  { %3276 = vmatmul.mubr.msk.f32.vlgmr.msra.gmra.mxu0 %vm187_vm2, %v1547_v18 }
 0xb1a   :  { %3290 = vmatpush3.msra.mxu0 %v4333_v11  ;;  %3297 = vmatprep.mubr.msk.f32.mxu0 %vm3912_vm1, %v3911_v3 }
 0xb1b   :  { %3291 = vmatprep.subr.mxu0 %v3911_v3 }
 0xb1c   :  { %3292 = vmatpush3.msra.mxu0 %v4465_v17 }
 0xb1d   :  { %3293 = vmatprep.subr.mxu0 %v3911_v3 }
 0xb1e   :  { %3294 = vmatpush3.msra.mxu0 %v4472_v40 }
 0xb1f   :  { %3295 = vmatprep.subr.mxu0 %v3911_v3 }
 0xb20   :  { %3296 = vmatpush3.msra.mxu0 %v4479_v52 }
 0xb21   :  { %3311 = vmatprep.subr.mxu0 %v3911_v3 }
 0xbd9   :  { %v1616_v32 = vpop.f32.mrf.mxu0 }
 0xbda   :  { %v1621_v15 = vrot.slane %v1616_v32, 4  ;;  %v1623_v20 = vrot.slane %v1616_v32, 6  ;;  %v1625_v25 = vrot.slane %v1616_v32, 1  ;;  %v1622_v51 = vrot.slane %v1616_v32, 5 }
 0xbdb   :  { %v3277_v11 = vpop.f32.mrf.mxu0  ;;  %v1640_v26 = vadd.f32 %v1616_v32, %v4088_v39  ;;  %v1626_v30 = vrot.slane %v1616_v32, 2  ;;  %v1624_v14 = vrot.slane %v1616_v32, 7  ;;  %v1627_v29 = vrot.slane %v1616_v32, 3 }
 0xbdc   :  { %v1636_v8 = vadd.f32 %v1621_v15, %v4071_v19  ;;  %v1638_v49 = vadd.f32 %v1623_v20, %v4082_v31  ;;  %v1641_v56 = vadd.f32 %v1625_v25, %v4085_v35  ;;  %v1637_v59 = vadd.f32 %v1622_v51, %v4078_v27 }
 0xbdd   :  { %v1642_v57 = vadd.f32 %v1626_v30, %v4094_v46  ;;  %v1639_v63 = vadd.f32 %v1624_v14, %v4073_v21  ;;  %v1643_v28 = vadd.f32 %v1627_v29, %v4091_v43  ;;  %v3119_v38 = vmul.f32 -1.442695, %v1640_v26 }
 0xbde   :  { %3586 = vtanh.f32 %v1636_v8  ;;  %v3115_v4 = vmul.f32 -1.442695, %v1636_v8  ;;  %v3117_v61 = vmul.f32 -1.442695, %v1638_v49  ;;  %v3120_v13 = vmul.f32 -1.442695, %v1641_v56 }
 0xbdf   :  { %3588 = vtanh.f32 %v1638_v49  ;;  %v3116_v53 = vmul.f32 -1.442695, %v1637_v59  ;;  %v3121_v55 = vmul.f32 -1.442695, %v1642_v57  ;;  %v3118_v9 = vmul.f32 -1.442695, %v1639_v63 }
 0xbe0   :  { %3590 = vtanh.f32 %v1640_v26  ;;  %v3122_v54 = vmul.f32 -1.442695, %v1643_v28 }
 0xbe1   :  { %3592 = vtanh.f32 %v1641_v56 }
 0xbe2   :  { %3594 = vtanh.f32 %v1637_v59 }
 0xbe3   :  { %3596 = vtanh.f32 %v1642_v57 }
 0xbe4   :  { %3598 = vtanh.f32 %v1639_v63 }
 0xbe5   :  { %3600 = vtanh.f32 %v1643_v28 }
 0xbe6   :  { %3602 = vpow2.f32 %v3115_v4 }
 0xbe7   :  { %3604 = vpow2.f32 %v3117_v61 }
 0xbe8   :  { %3606 = vpow2.f32 %v3119_v38 }
 0xbe9   :  { %3608 = vpow2.f32 %v3120_v13 }
 0xbea   :  { %3610 = vpow2.f32 %v3116_v53  ;;  %v1708_v53 = vrot.slane %v4549_v47, 7 }
 0xbeb   :  { %v3587_v45 = vpop.eup %3586  ;;  %3612 = vpow2.f32 %v3121_v55 }
 0xbec   :  { %1740 = vrot.lane.b32.xlu0 %v3587_v45, %s3913_s5  ;;  %v3589_v6 = vpop.eup %3588  ;;  %3614 = vpow2.f32 %v3118_v9 }
 0xbed   :  { %v3591_v1 = vpop.eup %3590 }
 0xbee   :  { %1748 = vrot.lane.b32.xlu1 %v3591_v1, %s3913_s5  ;;  %v3593_v10 = vpop.eup %3592 }
 0xbef   :  { %v3595_v36 = vpop.eup %3594 }
 0xbf0   :  { %1744 = vrot.lane.b32.xlu0 %v3589_v6, %s3913_s5  ;;  %v3597_v5 = vpop.eup %3596 }
 0xbf1   :  { %v3599_v24 = vpop.eup %3598 }
 0xbf2   :  { %1742 = vrot.lane.b32.xlu1 %v3595_v36, %s3913_s5  ;;  %v3601_v37 = vpop.eup %3600 }
 0xbf3   :  { %v3603_v23 = vpop.eup %3602 }
 0xbf4   :  { %1750 = vrot.lane.b32.xlu0 %v3593_v10, %s3913_s5  ;;  %v1668_v60 = vadd.f32 1.0, %v3603_v23  ;;  %v3605_v22 = vpop.eup %3604 }
 0xbf5   :  { %v3607_v48 = vpop.eup %3606  ;;  %v1670_v58 = vadd.f32 1.0, %v3605_v22 }
 0xbf6   :  { %1746 = vrot.lane.b32.xlu1 %v3599_v24, %s3913_s5  ;;  %3616 = vrcp.f32 %v1668_v60  ;;  %v3609_v50 = vpop.eup %3608  ;;  %v1672_v2 = vadd.f32 1.0, %v3607_v48  ;;  %v1710_v60 = vrot.slane %v4559_v7, 7 }
 0xbf7   :  { %3618 = vpow2.f32 %v3122_v54  ;;  %v3611_v44 = vpop.eup %3610  ;;  %v1673_v34 = vadd.f32 1.0, %v3609_v50  ;;  %v1712_v54 = vrot.slane %v4546_v42, 7  ;;  %v1714_v42 = vrot.slane %v4567_v33, 7 }
 0xbf8   :  { %1752 = vrot.lane.b32.xlu0 %v3597_v5, %s3913_s5  ;;  %3620 = vrcp.f32 %v1670_v58  ;;  %v3613_v12 = vpop.eup %3612  ;;  %v1669_v32 = vadd.f32 1.0, %v3611_v44  ;;  %v1713_v58 = vrot.slane %v4556_v62, 7  ;;  %v1709_v44 = vrot.slane %v4536_v0, 7 }
 0xbf9   :  { %v3615_v18 = vpop.eup %3614  ;;  %3622 = vrcp.f32 %v1672_v2  ;;  %v1674_v8 = vadd.f32 1.0, %v3613_v12 }
 0xbfa   :  { %1754 = vrot.lane.b32.xlu1 %v3601_v37, %s3913_s5  ;;  %3624 = vrcp.f32 %v1673_v34  ;;  %v1671_v25 = vadd.f32 1.0, %v3615_v18 }
 0xbfb   :  { %3626 = vrcp.f32 %v1669_v32 }
 0xbfc   :  { %3628 = vrcp.f32 %v1674_v8  ;;  %v1711_v8 = vrot.slane %v4539_v41, 7 }
 0xbfd   :  { %3630 = vrcp.f32 %v1671_v25 }
 0xc03   :  { %v4622_v15 = vpop.eup %3616 }
 0xc04   :  { %v3619_v49 = vpop.eup %3618  ;;  %v1724_v23 = vmul.f32 %v4622_v15, %v1708_v53 }
 0xc05   :  { %v1675_v51 = vadd.f32 1.0, %v3619_v49  ;;  %v4626_v26 = vpop.eup %3620 }
 0xc06   :  { %v4629_v14 = vpop.eup %3622  ;;  %v1726_v22 = vmul.f32 %v4626_v26, %v1710_v60 }
 0xc07   :  { %3632 = vrcp.f32 %v1675_v51  ;;  %v4633_v57 = vpop.eup %3624  ;;  %v1728_v50 = vmul.f32 %v4629_v14, %v1712_v54 }
 0xc08   :  { %v4637_v28 = vpop.eup %3626  ;;  %v1729_v7 = vmul.f32 %v4633_v57, %v1713_v58 }
 0xc09   :  { %v4641_v10 = vpop.eup %3628  ;;  %v1725_v62 = vmul.f32 %v4637_v28, %v1709_v44 }
 0xc0a   :  { %v4645_v24 = vpop.eup %3630 }
 0xc0b   :  { %v1727_v33 = vmul.f32 %v4645_v24, %v1711_v8 }
 0xc14   :  { %v4650_v61 = vpop.eup %3632 }
 0xc5e   :  { %v1741_v11 = vpop.permute.xlu0 %1740 }
 0xc5f   :  { %v1764_v20 = vmul.f32 %v4622_v15, %v1741_v11 }
 0xc60   :  { %v1749_v59 = vpop.permute.xlu1 %1748 }
 0xc61   :  { %1780 = vrot.lane.b32.xlu0 %v1764_v20, %s3914_s24  ;;  %v1768_v45 = vmul.f32 %v4629_v14, %v1749_v59  ;;  %v1730_v20 = vmul.f32 %v4641_v10, %v1714_v42 }
 0xc62   :  { %v1745_v30 = vpop.permute.xlu0 %1744 }
 0xc63   :  { %v1766_v56 = vmul.f32 %v4626_v26, %v1745_v30  ;;  %1788 = vrot.lane.b32.xlu1 %v1768_v45, %s3914_s24  ;;  %v1715_v30 = vrot.slane %v4565_v16, 7 }
 0xc64   :  { %v1743_v6 = vpop.permute.xlu1 %1742 }
 0xc65   :  { %1784 = vrot.lane.b32.xlu0 %v1766_v56, %s3914_s24  ;;  %v1765_v1 = vmul.f32 %v4637_v28, %v1743_v6  ;;  %v1731_v41 = vmul.f32 %v4650_v61, %v1715_v30 }
 0xc66   :  { %v1751_v29 = vpop.permute.xlu0 %1750 }
 0xc67   :  { %v1769_v63 = vmul.f32 %v4633_v57, %v1751_v29  ;;  %1782 = vrot.lane.b32.xlu1 %v1765_v1, %s3914_s24 }
 0xc68   :  { %v1747_v37 = vpop.permute.xlu1 %1746 }
 0xc69   :  { %1790 = vrot.lane.b32.xlu0 %v1769_v63, %s3914_s24  ;;  %v1767_v4 = vmul.f32 %v4645_v24, %v1747_v37 }
 0xc6a   :  { %v1753_v36 = vpop.permute.xlu0 %1752 }
 0xc6b   :  { %v1770_v5 = vmul.f32 %v4641_v10, %v1753_v36  ;;  %1786 = vrot.lane.b32.xlu1 %v1767_v4, %s3914_s24 }
 0xc6c   :  { %v1755_v38 = vpop.permute.xlu1 %1754 }
 0xc6d   :  { %1792 = vrot.lane.b32.xlu0 %v1770_v5, %s3914_s24  ;;  %v1771_v13 = vmul.f32 %v4650_v61, %v1755_v38 }
 0xc6f   :  { %1794 = vrot.lane.b32.xlu1 %v1771_v13, %s3914_s24 }
 0xcd3   :  { %v1781_v55 = vpop.permute.xlu0 %1780 }
 0xcd4   :  { %v4656_v9 = vadd.f32 %v1781_v55, %v1724_v23 }
 0xcd5   :  { %v1789_v47 = vpop.permute.xlu1 %1788 }
 0xcd6   :  { %3634 = vtanh.f32 %v4656_v9  ;;  %v4667_v34 = vadd.f32 %v1789_v47, %v1728_v50 }
 0xcd7   :  { %v1785_v48 = vpop.permute.xlu0 %1784 }
 0xcd8   :  { %v4664_v2 = vadd.f32 %v1785_v48, %v1726_v22 }
 0xcd9   :  { %v1783_v11 = vpop.permute.xlu1 %1782 }
 0xcda   :  { %3636 = vtanh.f32 %v4664_v2  ;;  %v4677_v0 = vadd.f32 %v1783_v11, %v1725_v62 }
 0xcdb   :  { %v1791_v12 = vpop.permute.xlu0 %1790  ;;  %3638 = vtanh.f32 %v4667_v34 }
 0xcdc   :  { %v4674_v18 = vadd.f32 %v1791_v12, %v1729_v7 }
 0xcdd   :  { %v1787_v51 = vpop.permute.xlu1 %1786 }
 0xcde   :  { %3640 = vtanh.f32 %v4674_v18  ;;  %v4687_v56 = vadd.f32 %v1787_v51, %v1727_v33 }
 0xcdf   :  { %v1793_v25 = vpop.permute.xlu0 %1792  ;;  %3642 = vtanh.f32 %v4677_v0 }
 0xce0   :  { %v4684_v49 = vadd.f32 %v1793_v25, %v1730_v20 }
 0xce1   :  { %v1795_v59 = vpop.permute.xlu1 %1794 }
 0xce2   :  { %3644 = vtanh.f32 %v4684_v49  ;;  %v4692_v45 = vadd.f32 %v1795_v59, %v1731_v41 }
 0xce3   :  { %v3635_v32 = vpop.eup %3634  ;;  %3646 = vtanh.f32 %v4687_v56 }
 0xce4   :  { %1828 = vrot.lane.b32.xlu0 %v3635_v32, %s3913_s5  ;;  %3648 = vtanh.f32 %v4692_v45 }
 0xce7   :  { %v3637_v29 = vpop.eup %3636 }
 0xce8   :  { %1832 = vrot.lane.b32.xlu0 %v3637_v29, %s3913_s5  ;;  %v3639_v63 = vpop.eup %3638 }
 0xce9   :  { %1836 = vrot.lane.b32.xlu1 %v3639_v63, %s3913_s5 }
 0xceb   :  { %v3641_v16 = vpop.eup %3640 }
 0xcec   :  { %1838 = vrot.lane.b32.xlu0 %v3641_v16, %s3913_s5  ;;  %v3643_v6 = vpop.eup %3642 }
 0xced   :  { %1830 = vrot.lane.b32.xlu1 %v3643_v6, %s3913_s5 }
 0xcef   :  { %v3645_v1 = vpop.eup %3644 }
 0xcf0   :  { %1840 = vrot.lane.b32.xlu0 %v3645_v1, %s3913_s5  ;;  %v3647_v36 = vpop.eup %3646 }
 0xcf1   :  { %1834 = vrot.lane.b32.xlu1 %v3647_v36, %s3913_s5  ;;  %v3649_v5 = vpop.eup %3648 }
 0xcf5   :  { %1842 = vrot.lane.b32.xlu1 %v3649_v5, %s3913_s5 }
 0xd56   :  { %v1829_v37 = vpop.permute.xlu0 %1828 }
 0xd57   :  { %v1852_v23 = vmul.f32 %v4622_v15, %v1829_v37 }
 0xd59   :  { %v1868_v48 = vrot.slane %v1852_v23, 4 }
 0xd5a   :  { %v1833_v4 = vpop.permute.xlu0 %1832 }
 0xd5b   :  { %v1837_v38 = vpop.permute.xlu1 %1836  ;;  %v1854_v13 = vmul.f32 %v4626_v26, %v1833_v4 }
 0xd5c   :  { %v1856_v62 = vmul.f32 %v4629_v14, %v1837_v38  ;;  %v3846_v14 = vld [vmem:[%s5102_s4 + $0x18] sm:$0xff] }
 0xd5d   :  { %v1871_v54 = vrot.slane %v1854_v13, 2 }
 0xd5e   :  { %v1839_v53 = vpop.permute.xlu0 %1838 }
 0xd5f   :  { %v1831_v55 = vpop.permute.xlu1 %1830  ;;  %v1857_v50 = vmul.f32 %v4633_v57, %v1839_v53 }
 0xd60   :  { %v1853_v60 = vmul.f32 %v4637_v28, %v1831_v55 }
 0xd61   :  { %v1876_v15 = vrot.slane %v1857_v50, 7 }
 0xd62   :  { %v1841_v22 = vpop.permute.xlu0 %1840  ;;  %v1869_v58 = vrot.slane %v1853_v60, 3 }
 0xd63   :  { %v1835_v47 = vpop.permute.xlu1 %1834  ;;  %v1858_v44 = vmul.f32 %v4641_v10, %v1841_v22 }
 0xd64   :  { %v1870_v7 = vsel %vm518_vm3, %v1869_v58, %v1868_v48  ;;  %v1855_v12 = vmul.f32 %v4645_v24, %v1835_v47 }
 0xd65   :  { %v1872_v26 = vsel %vm521_vm4, %v1871_v54, %v1870_v7  ;;  %v1878_v32 = vrot.slane %v1858_v44, 6 }
 0xd66   :  { %v1873_v42 = vrot.slane %v1855_v12, 1 }
 0xd67   :  { %v1843_v28 = vpop.permute.xlu1 %1842 }
 0xd68   :  { %v1874_v11 = vsel %vm524_vm5, %v1873_v42, %v1872_v26  ;;  %v1859_v8 = vmul.f32 %v4650_v61, %v1843_v28 }
 0xd69   :  { %v1875_v57 = vsel %vm527_vm6, %v1856_v62, %v1874_v11 }
 0xd6a   :  { %v1877_v10 = vsel %vm530_vm7, %v1876_v15, %v1875_v57  ;;  %v1880_v20 = vrot.slane %v1859_v8, 5 }
 0xd6b   :  { %v1879_v25 = vsel %vm533_vm8, %v1878_v32, %v1877_v10 }
 0xd6c   :  { %v1881_v24 = vsel %vm536_vm9, %v1880_v20, %v1879_v25 }
 0xd6d   :  { %1882 = vrot.lane.b32.xlu0 %v1881_v24, %s3914_s24 }
 0xddf   :  { %v1883_v33 = vpop.permute.xlu0 %1882 }
 0xde0   :  { %3287 = vmatmul.mubr.msk.f32.vlgmr.msra.gmra.mxu1 %vm187_vm2, %v1883_v33 }
 0xde1   :  { %3301 = vmatpush3.msra.mxu1 %v3846_v14  ;;  %3308 = vmatprep.mubr.msk.f32.mxu1 %vm3912_vm1, %v3911_v3 }
 0xde2   :  { %3302 = vmatprep.subr.mxu1 %v3911_v3 }
 0xde3   :  { %3303 = vmatpush3.msra.mxu1 %v4465_v17 }
 0xde4   :  { %3304 = vmatprep.subr.mxu1 %v3911_v3 }
 0xde5   :  { %3305 = vmatpush3.msra.mxu1 %v4472_v40 }
 0xde6   :  { %3306 = vmatprep.subr.mxu1 %v3911_v3 }
 0xde7   :  { %3307 = vmatpush3.msra.mxu1 %v4479_v52 }
 0xea0   :  { %v1952_v61 = vpop.f32.mrf.mxu1 }
 0xea1   :  { %v1957_v51 = vrot.slane %v1952_v61, 3  ;;  %v1958_v59 = vrot.slane %v1952_v61, 4  ;;  %v1959_v29 = vrot.slane %v1952_v61, 5  ;;  %v1960_v63 = vrot.slane %v1952_v61, 6 }
 0xea2   :  { %v3288_v30 = vpop.f32.mrf.mxu1  ;;  %v1961_v17 = vrot.slane %v1952_v61, 7  ;;  %v1962_v1 = vrot.slane %v1952_v61, 1  ;;  %v1963_v5 = vrot.slane %v1952_v61, 2  ;;  %v1977_v4 = vadd.f32 %v1952_v61, %v4085_v35 }
 0xea3   :  { %v1972_v41 = vadd.f32 %v1957_v51, %v4071_v19  ;;  %v1973_v16 = vadd.f32 %v1958_v59, %v4078_v27  ;;  %v1974_v6 = vadd.f32 %v1959_v29, %v4082_v31  ;;  %v1975_v40 = vadd.f32 %v1960_v63, %v4073_v21 }
 0xea4   :  { %v1976_v52 = vadd.f32 %v1961_v17, %v4088_v39  ;;  %v1978_v37 = vadd.f32 %v1962_v1, %v4094_v46  ;;  %v1979_v38 = vadd.f32 %v1963_v5, %v4091_v43  ;;  %v3129_v26 = vmul.f32 -1.442695, %v1977_v4 }
 0xea5   :  { %3650 = vtanh.f32 %v1972_v41  ;;  %v3124_v48 = vmul.f32 -1.442695, %v1972_v41  ;;  %v3125_v58 = vmul.f32 -1.442695, %v1973_v16  ;;  %v3126_v50 = vmul.f32 -1.442695, %v1974_v6 }
 0xea6   :  { %3652 = vtanh.f32 %v1973_v16  ;;  %v3127_v47 = vmul.f32 -1.442695, %v1975_v40  ;;  %v3128_v44 = vmul.f32 -1.442695, %v1976_v52  ;;  %v3130_v12 = vmul.f32 -1.442695, %v1978_v37 }
 0xea7   :  { %3654 = vtanh.f32 %v1974_v6  ;;  %v3131_v15 = vmul.f32 -1.442695, %v1979_v38 }
 0xea8   :  { %3656 = vtanh.f32 %v1975_v40 }
 0xea9   :  { %3658 = vtanh.f32 %v1976_v52 }
 0xeaa   :  { %3660 = vtanh.f32 %v1978_v37 }
 0xeab   :  { %3662 = vtanh.f32 %v1977_v4 }
 0xeac   :  { %3664 = vtanh.f32 %v1979_v38 }
 0xead   :  { %3666 = vpow2.f32 %v3124_v48 }
 0xeae   :  { %3668 = vpow2.f32 %v3125_v58  ;;  %v2044_v58 = vrot.slane %v4656_v9, 7 }
 0xeaf   :  { %3670 = vpow2.f32 %v3126_v50 }
 0xeb0   :  { %3672 = vpow2.f32 %v3127_v47 }
 0xeb1   :  { %3674 = vpow2.f32 %v3128_v44 }
 0xeb2   :  { %v3651_v36 = vpop.eup %3650  ;;  %3676 = vpow2.f32 %v3130_v12  ;;  %v2046_v12 = vrot.slane %v4664_v2, 7 }
 0xeb3   :  { %2076 = vrot.lane.b32.xlu1 %v3651_v36, %s3913_s5  ;;  %v3653_v13 = vpop.eup %3652  ;;  %3678 = vpow2.f32 %v3129_v26 }
 0xeb4   :  { %v3655_v53 = vpop.eup %3654  ;;  %2078 = vrot.lane.b32.xlu0 %v3653_v13, %s3913_s5 }
 0xeb5   :  { %v3657_v23 = vpop.eup %3656 }
 0xeb6   :  { %v3659_v55 = vpop.eup %3658 }
 0xeb7   :  { %2080 = vrot.lane.b32.xlu1 %v3655_v53, %s3913_s5  ;;  %v3661_v60 = vpop.eup %3660 }
 0xeb8   :  { %2082 = vrot.lane.b32.xlu0 %v3657_v23, %s3913_s5  ;;  %v3663_v54 = vpop.eup %3662 }
 0xeb9   :  { %v3665_v22 = vpop.eup %3664 }
 0xeba   :  { %v3667_v7 = vpop.eup %3666 }
 0xebb   :  { %2084 = vrot.lane.b32.xlu1 %v3659_v55, %s3913_s5  ;;  %v2004_v42 = vadd.f32 1.0, %v3667_v7  ;;  %v3669_v62 = vpop.eup %3668  ;;  %v2045_v7 = vrot.slane %v4677_v0, 7 }
 0xebc   :  { %2088 = vrot.lane.b32.xlu0 %v3661_v60, %s3913_s5  ;;  %v3671_v28 = vpop.eup %3670  ;;  %v2005_v32 = vadd.f32 1.0, %v3669_v62  ;;  %v2047_v62 = vrot.slane %v4687_v56, 7 }
 0xebd   :  { %3680 = vrcp.f32 %v2004_v42  ;;  %v3673_v11 = vpop.eup %3672  ;;  %v2006_v8 = vadd.f32 1.0, %v3671_v28 }
 0xebe   :  { %3682 = vpow2.f32 %v3131_v15  ;;  %v3675_v57 = vpop.eup %3674  ;;  %v2007_v10 = vadd.f32 1.0, %v3673_v11 }
 0xebf   :  { %2086 = vrot.lane.b32.xlu1 %v3663_v54, %s3913_s5  ;;  %3684 = vrcp.f32 %v2005_v32  ;;  %v3677_v20 = vpop.eup %3676  ;;  %v2008_v25 = vadd.f32 1.0, %v3675_v57  ;;  %v2048_v32 = vrot.slane %v4667_v34, 7  ;;  %v2050_v57 = vrot.slane %v4684_v49, 7 }
 0xec0   :  { %2090 = vrot.lane.b32.xlu0 %v3665_v22, %s3913_s5  ;;  %3686 = vrcp.f32 %v2006_v8  ;;  %v3679_v24 = vpop.eup %3678  ;;  %v2010_v14 = vadd.f32 1.0, %v3677_v20  ;;  %v2049_v20 = vrot.slane %v4674_v18, 7  ;;  %v2051_v49 = vrot.slane %v4692_v45, 7 }
 0xec1   :  { %3688 = vrcp.f32 %v2007_v10  ;;  %v2009_v30 = vadd.f32 1.0, %v3679_v24 }
 0xec2   :  { %3690 = vrcp.f32 %v2008_v25 }
 0xec3   :  { %3692 = vrcp.f32 %v2010_v14 }
 0xec4   :  { %3694 = vrcp.f32 %v2009_v30 }
 0xeca   :  { %v4746_v33 = vpop.eup %3680 }
 0xecb   :  { %v3683_v51 = vpop.eup %3682  ;;  %v2060_v50 = vmul.f32 %v4746_v33, %v2044_v58 }
 0xecc   :  { %v2011_v59 = vadd.f32 1.0, %v3683_v51  ;;  %v4750_v29 = vpop.eup %3684 }
 0xecd   :  { %v4752_v16 = vpop.eup %3686  ;;  %v2061_v26 = vmul.f32 %v4750_v29, %v2045_v7 }
 0xece   :  { %3696 = vrcp.f32 %v2011_v59  ;;  %v4757_v40 = vpop.eup %3688  ;;  %v2062_v15 = vmul.f32 %v4752_v16, %v2046_v12 }
 0xecf   :  { %v4760_v36 = vpop.eup %3690  ;;  %v2063_v0 = vmul.f32 %v4757_v40, %v2047_v62 }
 0xed0   :  { %v4765_v38 = vpop.eup %3692  ;;  %v2064_v2 = vmul.f32 %v4760_v36, %v2048_v32 }
 0xed1   :  { %v4768_v53 = vpop.eup %3694  ;;  %v2066_v24 = vmul.f32 %v4765_v38, %v2050_v57 }
 0xedb   :  { %v4773_v54 = vpop.eup %3696 }
 0xf25   :  { %v2077_v61 = vpop.permute.xlu1 %2076 }
 0xf26   :  { %v2100_v41 = vmul.f32 %v4746_v33, %v2077_v61  ;;  %v2079_v63 = vpop.permute.xlu0 %2078  ;;  %v2065_v61 = vmul.f32 %v4768_v53, %v2049_v20 }
 0xf27   :  { %v2101_v17 = vmul.f32 %v4750_v29, %v2079_v63 }
 0xf28   :  { %2116 = vrot.lane.b32.xlu1 %v2100_v41, %s3914_s24  ;;  %v2067_v41 = vmul.f32 %v4773_v54, %v2051_v49 }
 0xf29   :  { %v2081_v6 = vpop.permute.xlu1 %2080  ;;  %2118 = vrot.lane.b32.xlu0 %v2101_v17, %s3914_s24 }
 0xf2a   :  { %v2102_v1 = vmul.f32 %v4752_v16, %v2081_v6  ;;  %v2083_v52 = vpop.permute.xlu0 %2082 }
 0xf2b   :  { %v2103_v5 = vmul.f32 %v4757_v40, %v2083_v52 }
 0xf2c   :  { %2120 = vrot.lane.b32.xlu1 %v2102_v1, %s3914_s24 }
 0xf2d   :  { %v2085_v37 = vpop.permute.xlu1 %2084  ;;  %2122 = vrot.lane.b32.xlu0 %v2103_v5, %s3914_s24 }
 0xf2e   :  { %v2104_v4 = vmul.f32 %v4760_v36, %v2085_v37  ;;  %v2089_v13 = vpop.permute.xlu0 %2088 }
 0xf2f   :  { %v2106_v23 = vmul.f32 %v4765_v38, %v2089_v13 }
 0xf30   :  { %2124 = vrot.lane.b32.xlu1 %v2104_v4, %s3914_s24 }
 0xf31   :  { %v2087_v55 = vpop.permute.xlu1 %2086  ;;  %2128 = vrot.lane.b32.xlu0 %v2106_v23, %s3914_s24 }
 0xf32   :  { %v2105_v60 = vmul.f32 %v4768_v53, %v2087_v55  ;;  %v2091_v22 = vpop.permute.xlu0 %2090 }
 0xf33   :  { %v2107_v48 = vmul.f32 %v4773_v54, %v2091_v22 }
 0xf34   :  { %2126 = vrot.lane.b32.xlu1 %v2105_v60, %s3914_s24 }
 0xf35   :  { %2130 = vrot.lane.b32.xlu0 %v2107_v48, %s3914_s24 }
 0xf9a   :  { %v2117_v47 = vpop.permute.xlu1 %2116 }
 0xf9b   :  { %v4780_v44 = vadd.f32 %v2117_v47, %v2060_v50  ;;  %v2119_v42 = vpop.permute.xlu0 %2118 }
 0xf9c   :  { %v4788_v28 = vadd.f32 %v2119_v42, %v2061_v26 }
 0xf9d   :  { %3698 = vtanh.f32 %v4780_v44 }
 0xf9e   :  { %v2121_v9 = vpop.permute.xlu1 %2120  ;;  %3700 = vtanh.f32 %v4788_v28 }
 0xf9f   :  { %v4791_v11 = vadd.f32 %v2121_v9, %v2062_v15  ;;  %v2123_v8 = vpop.permute.xlu0 %2122 }
 0xfa0   :  { %v4798_v10 = vadd.f32 %v2123_v8, %v2063_v0 }
 0xfa1   :  { %3702 = vtanh.f32 %v4791_v11 }
 0xfa2   :  { %v2125_v56 = vpop.permute.xlu1 %2124  ;;  %3704 = vtanh.f32 %v4798_v10 }
 0xfa3   :  { %v4801_v25 = vadd.f32 %v2125_v56, %v2064_v2  ;;  %v2129_v14 = vpop.permute.xlu0 %2128 }
 0xfa4   :  { %v4809_v51 = vadd.f32 %v2129_v14, %v2066_v24 }
 0xfa5   :  { %3706 = vtanh.f32 %v4801_v25 }
 0xfa6   :  { %v2127_v30 = vpop.permute.xlu1 %2126  ;;  %3708 = vtanh.f32 %v4809_v51 }
 0xfa7   :  { %v4811_v18 = vadd.f32 %v2127_v30, %v2065_v61  ;;  %v2131_v59 = vpop.permute.xlu0 %2130 }
 0xfa8   :  { %v4816_v63 = vadd.f32 %v2131_v59, %v2067_v41 }
 0xfa9   :  { %3710 = vtanh.f32 %v4811_v18 }
 0xfaa   :  { %v3699_v34 = vpop.eup %3698  ;;  %3712 = vtanh.f32 %v4816_v63 }
 0xfab   :  { %2164 = vrot.lane.b32.xlu1 %v3699_v34, %s3913_s5  ;;  %v3701_v17 = vpop.eup %3700 }
 0xfac   :  { %2166 = vrot.lane.b32.xlu0 %v3701_v17, %s3913_s5 }
 0xfae   :  { %v3703_v6 = vpop.eup %3702 }
 0xfaf   :  { %2168 = vrot.lane.b32.xlu1 %v3703_v6, %s3913_s5  ;;  %v3705_v45 = vpop.eup %3704 }
 0xfb0   :  { %2170 = vrot.lane.b32.xlu0 %v3705_v45, %s3913_s5 }
 0xfb2   :  { %v3707_v1 = vpop.eup %3706 }
 0xfb3   :  { %2172 = vrot.lane.b32.xlu1 %v3707_v1, %s3913_s5  ;;  %v3709_v52 = vpop.eup %3708 }
 0xfb4   :  { %2176 = vrot.lane.b32.xlu0 %v3709_v52, %s3913_s5 }
 0xfb6   :  { %v3711_v5 = vpop.eup %3710 }
 0xfb7   :  { %2174 = vrot.lane.b32.xlu1 %v3711_v5, %s3913_s5  ;;  %v3713_v37 = vpop.eup %3712 }
 0xfb8   :  { %2178 = vrot.lane.b32.xlu0 %v3713_v37, %s3913_s5 }
0x101d   :  { %v2165_v4 = vpop.permute.xlu1 %2164 }
0x101e   :  { %v2188_v13 = vmul.f32 %v4746_v33, %v2165_v4  ;;  %v2167_v23 = vpop.permute.xlu0 %2166 }
0x101f   :  { %v2189_v55 = vmul.f32 %v4750_v29, %v2167_v23 }
0x1020   :  { %v2204_v60 = vrot.slane %v2188_v13, 5 }
0x1021   :  { %v2169_v22 = vpop.permute.xlu1 %2168  ;;  %v2205_v58 = vrot.slane %v2189_v55, 4 }
0x1022   :  { %v2190_v48 = vmul.f32 %v4752_v16, %v2169_v22  ;;  %v2171_v50 = vpop.permute.xlu0 %2170 }
0x1023   :  { %v2206_v7 = vsel %vm518_vm3, %v2205_v58, %v2204_v60  ;;  %v2191_v12 = vmul.f32 %v4757_v40, %v2171_v50 }
0x1024   :  { %v2207_v47 = vrot.slane %v2190_v48, 3 }
0x1025   :  { %v2173_v26 = vpop.permute.xlu1 %2172  ;;  %v2209_v33 = vrot.slane %v2191_v12, 2 }
0x1026   :  { %v2208_v42 = vsel %vm521_vm4, %v2207_v47, %v2206_v7  ;;  %v2192_v15 = vmul.f32 %v4760_v36, %v2173_v26  ;;  %v2177_v62 = vpop.permute.xlu0 %2176 }
0x1027   :  { %v2194_v29 = vmul.f32 %v4765_v38, %v2177_v62  ;;  %v2210_v32 = vsel %vm524_vm5, %v2209_v33, %v2208_v42 }
0x1028   :  { %v2211_v9 = vrot.slane %v2192_v15, 1 }
0x1029   :  { %v2175_v16 = vpop.permute.xlu1 %2174  ;;  %v2214_v2 = vrot.slane %v2194_v29, 7 }
0x102a   :  { %v2212_v0 = vsel %vm527_vm6, %v2211_v9, %v2210_v32  ;;  %v2193_v8 = vmul.f32 %v4768_v53, %v2175_v16  ;;  %v2179_v57 = vpop.permute.xlu0 %2178 }
0x102b   :  { %v2195_v56 = vmul.f32 %v4773_v54, %v2179_v57 }
0x102c   :  { %v2213_v40 = vsel %vm530_vm7, %v2193_v8, %v2212_v0 }
0x102d   :  { %v2215_v36 = vsel %vm533_vm8, %v2214_v2, %v2213_v40  ;;  %v2216_v20 = vrot.slane %v2195_v56, 6 }
0x102f   :  { %v2217_v34 = vsel %vm536_vm9, %v2216_v20, %v2215_v36 }
0x1030   :  { %2218 = vrot.lane.b32.xlu1 %v2217_v34, %s3914_s24 }
0x10a2   :  { %v2219_v38 = vpop.permute.xlu1 %2218 }
0x10a3   :  { %3298 = vmatmul.mubr.msk.f32.vlgmr.msra.gmra.mxu0 %vm187_vm2, %v2219_v38 }
0x10a4   :  { %3319 = vmatprep.mubr.msk.f32.mxu0 %vm3912_vm1, %v3911_v3 }
0x1163   :  { %v2288_v53 = vpop.f32.mrf.mxu0 }
0x1164   :  { %v2293_v24 = vrot.slane %v2288_v53, 2  ;;  %v2294_v54 = vrot.slane %v2288_v53, 3  ;;  %v2295_v49 = vrot.slane %v2288_v53, 4  ;;  %v2296_v30 = vrot.slane %v2288_v53, 5 }
0x1165   :  { %v3299_v14 = vpop.f32.mrf.mxu0  ;;  %v2297_v59 = vrot.slane %v2288_v53, 6  ;;  %v2298_v6 = vrot.slane %v2288_v53, 7  ;;  %v2299_v1 = vrot.slane %v2288_v53, 1  ;;  %v2314_v13 = vadd.f32 %v2288_v53, %v4094_v46 }
0x1166   :  { %v2308_v61 = vadd.f32 %v2293_v24, %v4071_v19  ;;  %v2309_v41 = vadd.f32 %v2294_v54, %v4078_v27  ;;  %v2310_v17 = vadd.f32 %v2295_v49, %v4082_v31  ;;  %v2311_v45 = vadd.f32 %v2296_v30, %v4073_v21 }
0x1167   :  { %v2312_v52 = vadd.f32 %v2297_v59, %v4088_v39  ;;  %v2313_v37 = vadd.f32 %v2298_v6, %v4085_v35  ;;  %v2315_v4 = vadd.f32 %v2299_v1, %v4091_v43  ;;  %v3139_v29 = vmul.f32 -1.442695, %v2314_v13 }
0x1168   :  { %3714 = vtanh.f32 %v2308_v61  ;;  %v3133_v47 = vmul.f32 -1.442695, %v2308_v61  ;;  %v3134_v7 = vmul.f32 -1.442695, %v2309_v41  ;;  %v3135_v12 = vmul.f32 -1.442695, %v2310_v17 }
0x1169   :  { %3716 = vtanh.f32 %v2309_v41  ;;  %v3136_v26 = vmul.f32 -1.442695, %v2311_v45  ;;  %v3137_v42 = vmul.f32 -1.442695, %v2312_v52  ;;  %v3138_v33 = vmul.f32 -1.442695, %v2313_v37 }
0x116a   :  { %3718 = vtanh.f32 %v2310_v17  ;;  %v3140_v62 = vmul.f32 -1.442695, %v2315_v4 }
0x116b   :  { %3720 = vtanh.f32 %v2311_v45 }
0x116c   :  { %3722 = vtanh.f32 %v2312_v52 }
0x116d   :  { %3724 = vtanh.f32 %v2313_v37 }
0x116e   :  { %3726 = vtanh.f32 %v2315_v4 }
0x116f   :  { %3728 = vtanh.f32 %v2314_v13 }
0x1170   :  { %3730 = vpow2.f32 %v3133_v47 }
0x1171   :  { %3732 = vpow2.f32 %v3134_v7  ;;  %v2380_v7 = vrot.slane %v4780_v44, 7 }
0x1172   :  { %3734 = vpow2.f32 %v3135_v12 }
0x1173   :  { %3736 = vpow2.f32 %v3136_v26 }
0x1174   :  { %3738 = vpow2.f32 %v3137_v42 }
0x1175   :  { %v3715_v5 = vpop.eup %3714  ;;  %3740 = vpow2.f32 %v3138_v33  ;;  %v2382_v33 = vrot.slane %v4791_v11, 7 }
0x1176   :  { %2412 = vrot.lane.b32.xlu0 %v3715_v5, %s3913_s5  ;;  %v3717_v23 = vpop.eup %3716  ;;  %3742 = vpow2.f32 %v3140_v62 }
0x1177   :  { %v3719_v55 = vpop.eup %3718  ;;  %2414 = vrot.lane.b32.xlu1 %v3717_v23, %s3913_s5 }
0x1178   :  { %v3721_v60 = vpop.eup %3720 }
0x1179   :  { %v3723_v22 = vpop.eup %3722 }
0x117a   :  { %2416 = vrot.lane.b32.xlu0 %v3719_v55, %s3913_s5  ;;  %v3725_v48 = vpop.eup %3724 }
0x117b   :  { %2418 = vrot.lane.b32.xlu1 %v3721_v60, %s3913_s5  ;;  %v3727_v58 = vpop.eup %3726 }
0x117c   :  { %v3729_v50 = vpop.eup %3728 }
0x117d   :  { %v3731_v15 = vpop.eup %3730 }
0x117e   :  { %2420 = vrot.lane.b32.xlu0 %v3723_v22, %s3913_s5  ;;  %v2340_v9 = vadd.f32 1.0, %v3731_v15  ;;  %v3733_v32 = vpop.eup %3732  ;;  %v2381_v15 = vrot.slane %v4788_v28, 7 }
0x117f   :  { %2422 = vrot.lane.b32.xlu1 %v3725_v48, %s3913_s5  ;;  %v3735_v16 = vpop.eup %3734  ;;  %v2341_v0 = vadd.f32 1.0, %v3733_v32  ;;  %v2383_v32 = vrot.slane %v4798_v10, 7 }
0x1180   :  { %3744 = vrcp.f32 %v2340_v9  ;;  %v3737_v8 = vpop.eup %3736  ;;  %v2342_v2 = vadd.f32 1.0, %v3735_v16 }
0x1181   :  { %3746 = vpow2.f32 %v3139_v29  ;;  %v3739_v57 = vpop.eup %3738  ;;  %v2343_v40 = vadd.f32 1.0, %v3737_v8 }
0x1182   :  { %2426 = vrot.lane.b32.xlu0 %v3727_v58, %s3913_s5  ;;  %3748 = vrcp.f32 %v2341_v0  ;;  %v3741_v56 = vpop.eup %3740  ;;  %v2344_v36 = vadd.f32 1.0, %v3739_v57  ;;  %v2384_v0 = vrot.slane %v4801_v25, 7  ;;  %v2385_v57 = vrot.slane %v4811_v18, 7 }
0x1183   :  { %2424 = vrot.lane.b32.xlu1 %v3729_v50, %s3913_s5  ;;  %3750 = vrcp.f32 %v2342_v2  ;;  %v3743_v20 = vpop.eup %3742  ;;  %v2345_v38 = vadd.f32 1.0, %v3741_v56  ;;  %v2387_v56 = vrot.slane %v4816_v63, 7  ;;  %v2386_v18 = vrot.slane %v4809_v51, 7 }
0x1184   :  { %3752 = vrcp.f32 %v2343_v40  ;;  %v2347_v14 = vadd.f32 1.0, %v3743_v20 }
0x1185   :  { %3754 = vrcp.f32 %v2344_v36 }
0x1186   :  { %3756 = vrcp.f32 %v2345_v38 }
0x1187   :  { %3758 = vrcp.f32 %v2347_v14 }
0x118d   :  { %v4861_v34 = vpop.eup %3744 }
0x118e   :  { %v3747_v24 = vpop.eup %3746  ;;  %v2396_v12 = vmul.f32 %v4861_v34, %v2380_v7 }
0x118f   :  { %v2346_v54 = vadd.f32 1.0, %v3747_v24  ;;  %v4865_v49 = vpop.eup %3748 }
0x1190   :  { %v4867_v41 = vpop.eup %3750  ;;  %v2397_v62 = vmul.f32 %v4865_v49, %v2381_v15 }
0x1191   :  { %3760 = vrcp.f32 %v2346_v54  ;;  %v4872_v45 = vpop.eup %3752  ;;  %v2398_v29 = vmul.f32 %v4867_v41, %v2382_v33 }
0x1192   :  { %v4875_v52 = vpop.eup %3754  ;;  %v2399_v28 = vmul.f32 %v4872_v45, %v2383_v32 }
0x1193   :  { %v4880_v13 = vpop.eup %3756  ;;  %v2400_v11 = vmul.f32 %v4875_v52, %v2384_v0 }
0x1194   :  { %v4883_v55 = vpop.eup %3758  ;;  %v2401_v20 = vmul.f32 %v4880_v13, %v2385_v57 }
0x119e   :  { %v4888_v58 = vpop.eup %3760 }
0x11e8   :  { %v2413_v53 = vpop.permute.xlu0 %2412 }
0x11e9   :  { %v2436_v61 = vmul.f32 %v4861_v34, %v2413_v53  ;;  %v2415_v30 = vpop.permute.xlu1 %2414  ;;  %v2403_v53 = vmul.f32 %v4883_v55, %v2387_v56 }
0x11ea   :  { %v2437_v59 = vmul.f32 %v4865_v49, %v2415_v30 }
0x11eb   :  { %2452 = vrot.lane.b32.xlu0 %v2436_v61, %s3914_s24  ;;  %v2402_v61 = vmul.f32 %v4888_v58, %v2386_v18 }
0x11ec   :  { %v2417_v17 = vpop.permute.xlu0 %2416  ;;  %2454 = vrot.lane.b32.xlu1 %v2437_v59, %s3914_s24 }
0x11ed   :  { %v2438_v6 = vmul.f32 %v4867_v41, %v2417_v17  ;;  %v2419_v1 = vpop.permute.xlu1 %2418 }
0x11ee   :  { %v2439_v5 = vmul.f32 %v4872_v45, %v2419_v1 }
0x11ef   :  { %2456 = vrot.lane.b32.xlu0 %v2438_v6, %s3914_s24 }
0x11f0   :  { %v2421_v37 = vpop.permute.xlu0 %2420  ;;  %2458 = vrot.lane.b32.xlu1 %v2439_v5, %s3914_s24 }
0x11f1   :  { %v2440_v4 = vmul.f32 %v4875_v52, %v2421_v37  ;;  %v2423_v23 = vpop.permute.xlu1 %2422 }
0x11f2   :  { %v2441_v60 = vmul.f32 %v4880_v13, %v2423_v23 }
0x11f3   :  { %2460 = vrot.lane.b32.xlu0 %v2440_v4, %s3914_s24 }
0x11f4   :  { %v2427_v22 = vpop.permute.xlu0 %2426  ;;  %2462 = vrot.lane.b32.xlu1 %v2441_v60, %s3914_s24 }
0x11f5   :  { %v2443_v48 = vmul.f32 %v4883_v55, %v2427_v22  ;;  %v2425_v50 = vpop.permute.xlu1 %2424 }
0x11f6   :  { %v2442_v47 = vmul.f32 %v4888_v58, %v2425_v50 }
0x11f7   :  { %2466 = vrot.lane.b32.xlu0 %v2443_v48, %s3914_s24 }
0x11f8   :  { %2464 = vrot.lane.b32.xlu1 %v2442_v47, %s3914_s24 }
0x125d   :  { %v2453_v26 = vpop.permute.xlu0 %2452 }
0x125e   :  { %v4895_v42 = vadd.f32 %v2453_v26, %v2396_v12  ;;  %v2455_v9 = vpop.permute.xlu1 %2454 }
0x125f   :  { %v4903_v16 = vadd.f32 %v2455_v9, %v2397_v62 }
0x1260   :  { %3762 = vtanh.f32 %v4895_v42 }
0x1261   :  { %v2457_v44 = vpop.permute.xlu0 %2456  ;;  %3764 = vtanh.f32 %v4903_v16 }
0x1262   :  { %v4906_v8 = vadd.f32 %v2457_v44, %v2398_v29  ;;  %v2459_v2 = vpop.permute.xlu1 %2458 }
0x1263   :  { %v4913_v40 = vadd.f32 %v2459_v2, %v2399_v28 }
0x1264   :  { %3766 = vtanh.f32 %v4906_v8 }
0x1265   :  { %v2461_v10 = vpop.permute.xlu0 %2460  ;;  %3768 = vtanh.f32 %v4913_v40 }
0x1266   :  { %v4916_v36 = vadd.f32 %v2461_v10, %v2400_v11  ;;  %v2463_v38 = vpop.permute.xlu1 %2462 }
0x1267   :  { %v4924_v24 = vadd.f32 %v2463_v38, %v2401_v20 }
0x1268   :  { %3770 = vtanh.f32 %v4916_v36 }
0x1269   :  { %v2467_v14 = vpop.permute.xlu0 %2466  ;;  %3772 = vtanh.f32 %v4924_v24 }
0x126a   :  { %v4926_v63 = vadd.f32 %v2467_v14, %v2403_v53  ;;  %v2465_v54 = vpop.permute.xlu1 %2464 }
0x126b   :  { %v4931_v30 = vadd.f32 %v2465_v54, %v2402_v61 }
0x126c   :  { %3774 = vtanh.f32 %v4926_v63 }
0x126d   :  { %v3763_v25 = vpop.eup %3762  ;;  %3776 = vtanh.f32 %v4931_v30 }
0x126e   :  { %2500 = vrot.lane.b32.xlu0 %v3763_v25, %s3913_s5  ;;  %v3765_v59 = vpop.eup %3764 }
0x126f   :  { %2502 = vrot.lane.b32.xlu1 %v3765_v59, %s3913_s5 }
0x1271   :  { %v3767_v17 = vpop.eup %3766 }
0x1272   :  { %2504 = vrot.lane.b32.xlu0 %v3767_v17, %s3913_s5  ;;  %v3769_v51 = vpop.eup %3768 }
0x1273   :  { %2506 = vrot.lane.b32.xlu1 %v3769_v51, %s3913_s5 }
0x1275   :  { %v3771_v6 = vpop.eup %3770 }
0x1276   :  { %2508 = vrot.lane.b32.xlu0 %v3771_v6, %s3913_s5  ;;  %v3773_v1 = vpop.eup %3772 }
0x1277   :  { %2510 = vrot.lane.b32.xlu1 %v3773_v1, %s3913_s5 }
0x1279   :  { %v3775_v5 = vpop.eup %3774 }
0x127a   :  { %2514 = vrot.lane.b32.xlu0 %v3775_v5, %s3913_s5  ;;  %v3777_v37 = vpop.eup %3776 }
0x127b   :  { %2512 = vrot.lane.b32.xlu1 %v3777_v37, %s3913_s5 }
0x12e0   :  { %v2501_v4 = vpop.permute.xlu0 %2500 }
0x12e1   :  { %v2524_v23 = vmul.f32 %v4861_v34, %v2501_v4  ;;  %v2503_v60 = vpop.permute.xlu1 %2502 }
0x12e2   :  { %v2525_v22 = vmul.f32 %v4865_v49, %v2503_v60 }
0x12e3   :  { %v2540_v48 = vrot.slane %v2524_v23, 6 }
0x12e4   :  { %v2505_v50 = vpop.permute.xlu0 %2504  ;;  %v2541_v7 = vrot.slane %v2525_v22, 5 }
0x12e5   :  { %v2526_v47 = vmul.f32 %v4867_v41, %v2505_v50  ;;  %v2507_v12 = vpop.permute.xlu1 %2506 }
0x12e6   :  { %v2542_v15 = vsel %vm518_vm3, %v2541_v7, %v2540_v48  ;;  %v2527_v33 = vmul.f32 %v4872_v45, %v2507_v12 }
0x12e7   :  { %v2543_v26 = vrot.slane %v2526_v47, 4 }
0x12e8   :  { %v2509_v62 = vpop.permute.xlu0 %2508  ;;  %v2545_v34 = vrot.slane %v2527_v33, 3 }
0x12e9   :  { %v2544_v9 = vsel %vm521_vm4, %v2543_v26, %v2542_v15  ;;  %v2528_v29 = vmul.f32 %v4875_v52, %v2509_v62  ;;  %v2511_v32 = vpop.permute.xlu1 %2510 }
0x12ea   :  { %v2529_v49 = vmul.f32 %v4880_v13, %v2511_v32  ;;  %v2546_v0 = vsel %vm524_vm5, %v2545_v34, %v2544_v9 }
0x12eb   :  { %v2547_v44 = vrot.slane %v2528_v29, 2 }
0x12ec   :  { %v2515_v41 = vpop.permute.xlu0 %2514  ;;  %v2549_v11 = vrot.slane %v2529_v49, 1 }
0x12ed   :  { %v2548_v28 = vsel %vm527_vm6, %v2547_v44, %v2546_v0  ;;  %v2531_v2 = vmul.f32 %v4883_v55, %v2515_v41  ;;  %v2513_v57 = vpop.permute.xlu1 %2512 }
0x12ee   :  { %v2530_v10 = vmul.f32 %v4888_v58, %v2513_v57  ;;  %v2550_v56 = vsel %vm530_vm7, %v2549_v11, %v2548_v28 }
0x12ef   :  { %v2552_v45 = vrot.slane %v2531_v2, 7 }
0x12f0   :  { %v2551_v52 = vsel %vm533_vm8, %v2530_v10, %v2550_v56 }
0x12f1   :  { %v2553_v25 = vsel %vm536_vm9, %v2552_v45, %v2551_v52 }
0x12f2   :  { %2554 = vrot.lane.b32.xlu0 %v2553_v25, %s3914_s24 }
0x1364   :  { %v2555_v13 = vpop.permute.xlu0 %2554 }
0x1365   :  { %3309 = vmatmul.mubr.msk.f32.vlgmr.msra.gmra.mxu1 %vm187_vm2, %v2555_v13 }
0x1425   :  { %v2624_v20 = vpop.f32.mrf.mxu1 }
0x1426   :  { %v2629_v38 = vrot.slane %v2624_v20, 1  ;;  %v2630_v18 = vrot.slane %v2624_v20, 2  ;;  %v2631_v14 = vrot.slane %v2624_v20, 3  ;;  %v2632_v58 = vrot.slane %v2624_v20, 4 }
0x1427   :  { %v3310_v53 = vpop.f32.mrf.mxu1  ;;  %v2633_v54 = vrot.slane %v2624_v20, 5  ;;  %v2634_v17 = vrot.slane %v2624_v20, 6  ;;  %v2635_v6 = vrot.slane %v2624_v20, 7 }
0x1428   :  { %v2644_v55 = vadd.f32 %v2629_v38, %v4071_v19  ;;  %v2645_v61 = vadd.f32 %v2630_v18, %v4078_v27  ;;  %v2646_v59 = vadd.f32 %v2631_v14, %v4082_v31  ;;  %v2647_v51 = vadd.f32 %v2632_v58, %v4073_v21 }
0x1429   :  { %v2648_v1 = vadd.f32 %v2633_v54, %v4088_v39  ;;  %v2649_v19 = vadd.f32 %v2634_v17, %v4085_v35  ;;  %v2650_v37 = vadd.f32 %v2635_v6, %v4094_v46  ;;  %v2651_v27 = vadd.f32 %v2624_v20, %v4091_v43 }
0x142a   :  { %3778 = vtanh.f32 %v2644_v55  ;;  %v3142_v23 = vmul.f32 -1.442695, %v2644_v55  ;;  %v3143_v60 = vmul.f32 -1.442695, %v2645_v61  ;;  %v3144_v22 = vmul.f32 -1.442695, %v2646_v59 }
0x142b   :  { %3780 = vtanh.f32 %v2645_v61  ;;  %v3145_v48 = vmul.f32 -1.442695, %v2647_v51  ;;  %v3146_v50 = vmul.f32 -1.442695, %v2648_v1  ;;  %v3147_v7 = vmul.f32 -1.442695, %v2649_v19 }
0x142c   :  { %3782 = vtanh.f32 %v2646_v59  ;;  %v3148_v12 = vmul.f32 -1.442695, %v2650_v37  ;;  %v3149_v15 = vmul.f32 -1.442695, %v2651_v27 }
0x142d   :  { %3784 = vtanh.f32 %v2647_v51 }
0x142e   :  { %3786 = vtanh.f32 %v2648_v1 }
0x142f   :  { %3788 = vtanh.f32 %v2649_v19 }
0x1430   :  { %3790 = vtanh.f32 %v2650_v37 }
0x1431   :  { %3792 = vtanh.f32 %v2651_v27 }
0x1432   :  { %3794 = vpow2.f32 %v3142_v23 }
0x1433   :  { %3796 = vpow2.f32 %v3143_v60 }
0x1434   :  { %3798 = vpow2.f32 %v3144_v22  ;;  %v2719_v22 = vrot.slane %v4913_v40, 7  ;;  %v2722_v40 = vrot.slane %v4931_v30, 7 }
0x1435   :  { %3800 = vpow2.f32 %v3145_v48 }
0x1436   :  { %3802 = vpow2.f32 %v3146_v50  ;;  %v2720_v50 = vrot.slane %v4916_v36, 7 }
0x1437   :  { %v3779_v5 = vpop.eup %3778  ;;  %3804 = vpow2.f32 %v3147_v7 }
0x1438   :  { %2748 = vrot.lane.b32.xlu1 %v3779_v5, %s3913_s5  ;;  %v3781_v21 = vpop.eup %3780  ;;  %3806 = vpow2.f32 %v3148_v12 }
0x1439   :  { %v3783_v31 = vpop.eup %3782  ;;  %2750 = vrot.lane.b32.xlu0 %v3781_v21, %s3913_s5  ;;  %v2716_v21 = vrot.slane %v4895_v42, 7 }
0x143a   :  { %v3785_v39 = vpop.eup %3784 }
0x143b   :  { %v3787_v4 = vpop.eup %3786 }
0x143c   :  { %2752 = vrot.lane.b32.xlu1 %v3783_v31, %s3913_s5  ;;  %v3789_v35 = vpop.eup %3788 }
0x143d   :  { %2754 = vrot.lane.b32.xlu0 %v3785_v39, %s3913_s5  ;;  %v3791_v46 = vpop.eup %3790 }
0x143e   :  { %v3793_v43 = vpop.eup %3792 }
0x143f   :  { %v3795_v47 = vpop.eup %3794 }
0x1440   :  { %2756 = vrot.lane.b32.xlu1 %v3787_v4, %s3913_s5  ;;  %v2676_v26 = vadd.f32 1.0, %v3795_v47  ;;  %v3797_v33 = vpop.eup %3796 }
0x1441   :  { %2758 = vrot.lane.b32.xlu0 %v3789_v35, %s3913_s5  ;;  %v3799_v62 = vpop.eup %3798  ;;  %v2677_v9 = vadd.f32 1.0, %v3797_v33  ;;  %v2717_v35 = vrot.slane %v4903_v16, 7 }
0x1442   :  { %3808 = vrcp.f32 %v2676_v26  ;;  %v3801_v29 = vpop.eup %3800  ;;  %v2678_v34 = vadd.f32 1.0, %v3799_v62 }
0x1443   :  { %3810 = vpow2.f32 %v3149_v15  ;;  %v3803_v32 = vpop.eup %3802  ;;  %v2679_v44 = vadd.f32 1.0, %v3801_v29  ;;  %v2721_v15 = vrot.slane %v4924_v24, 7  ;;  %v2723_v24 = vrot.slane %v4926_v63, 7 }
0x1444   :  { %2760 = vrot.lane.b32.xlu1 %v3791_v46, %s3913_s5  ;;  %3812 = vrcp.f32 %v2677_v9  ;;  %v3805_v49 = vpop.eup %3804  ;;  %v2680_v0 = vadd.f32 1.0, %v3803_v32  ;;  %v2718_v46 = vrot.slane %v4906_v8, 7 }
0x1445   :  { %2762 = vrot.lane.b32.xlu0 %v3793_v43, %s3913_s5  ;;  %3814 = vrcp.f32 %v2678_v34  ;;  %v3807_v41 = vpop.eup %3806  ;;  %v2681_v2 = vadd.f32 1.0, %v3805_v49 }
0x1446   :  { %3816 = vrcp.f32 %v2679_v44  ;;  %v2682_v45 = vadd.f32 1.0, %v3807_v41 }
0x1447   :  { %3818 = vrcp.f32 %v2680_v0 }
0x1448   :  { %3820 = vrcp.f32 %v2681_v2 }
0x1449   :  { %3822 = vrcp.f32 %v2682_v45 }
0x144f   :  { %v4974_v28 = vpop.eup %3808 }
0x1450   :  { %v3811_v57 = vpop.eup %3810  ;;  %v2732_v31 = vmul.f32 %v4974_v28, %v2716_v21  ;;  %v2869_v21 = vld [vmem:[%s5104_s6 + $0x8] sm:$0xff] }
0x1451   :  { %v2683_v56 = vadd.f32 1.0, %v3811_v57  ;;  %v4978_v52 = vpop.eup %3812 }
0x1452   :  { %v4980_v13 = vpop.eup %3814  ;;  %v2733_v43 = vmul.f32 %v4978_v52, %v2717_v35 }
0x1453   :  { %3824 = vrcp.f32 %v2683_v56  ;;  %v4985_v55 = vpop.eup %3816  ;;  %v2734_v60 = vmul.f32 %v4980_v13, %v2718_v46 }
0x1454   :  { %v4988_v14 = vpop.eup %3818  ;;  %v2735_v7 = vmul.f32 %v4985_v55, %v2719_v22 }
0x1455   :  { %v4993_v59 = vpop.eup %3820  ;;  %v2736_v8 = vmul.f32 %v4988_v14, %v2720_v50 }
0x1456   :  { %v4996_v51 = vpop.eup %3822  ;;  %v2737_v32 = vmul.f32 %v4993_v59, %v2721_v15 }
0x1457   :  { %v2738_v0 = vmul.f32 %v4996_v51, %v2722_v40 }
0x1460   :  { %v5001_v19 = vpop.eup %3824 }
0x14aa   :  { %v2749_v11 = vpop.permute.xlu1 %2748 }
0x14ab   :  { %v2772_v10 = vmul.f32 %v4974_v28, %v2749_v11  ;;  %v2751_v25 = vpop.permute.xlu0 %2750 }
0x14ac   :  { %v2773_v20 = vmul.f32 %v4978_v52, %v2751_v25 }
0x14ad   :  { %2788 = vrot.lane.b32.xlu1 %v2772_v10, %s3914_s24  ;;  %v2739_v10 = vmul.f32 %v5001_v19, %v2723_v24 }
0x14ae   :  { %v2753_v38 = vpop.permute.xlu1 %2752  ;;  %2790 = vrot.lane.b32.xlu0 %v2773_v20, %s3914_s24 }
0x14af   :  { %v2774_v53 = vmul.f32 %v4980_v13, %v2753_v38  ;;  %v2755_v18 = vpop.permute.xlu0 %2754 }
0x14b0   :  { %v2775_v58 = vmul.f32 %v4985_v55, %v2755_v18 }
0x14b1   :  { %2792 = vrot.lane.b32.xlu1 %v2774_v53, %s3914_s24 }
0x14b2   :  { %v2757_v61 = vpop.permute.xlu1 %2756  ;;  %2794 = vrot.lane.b32.xlu0 %v2775_v58, %s3914_s24 }
0x14b3   :  { %v2776_v54 = vmul.f32 %v4988_v14, %v2757_v61  ;;  %v2759_v17 = vpop.permute.xlu0 %2758 }
0x14b4   :  { %v2777_v6 = vmul.f32 %v4993_v59, %v2759_v17 }
0x14b5   :  { %2796 = vrot.lane.b32.xlu1 %v2776_v54, %s3914_s24 }
0x14b6   :  { %v2761_v1 = vpop.permute.xlu1 %2760  ;;  %2798 = vrot.lane.b32.xlu0 %v2777_v6, %s3914_s24 }
0x14b7   :  { %v2778_v5 = vmul.f32 %v4996_v51, %v2761_v1  ;;  %v2763_v37 = vpop.permute.xlu0 %2762 }
0x14b8   :  { %v2779_v27 = vmul.f32 %v5001_v19, %v2763_v37  ;;  %v2871_v37 = vld [vmem:[%s5104_s6 + $0x18] sm:$0xff] }
0x14b9   :  { %2800 = vrot.lane.b32.xlu1 %v2778_v5, %s3914_s24  ;;  %3312 = vmatpush3.msra.mxu0 %v2871_v37 }
0x14ba   :  { %2802 = vrot.lane.b32.xlu0 %v2779_v27, %s3914_s24  ;;  %v2870_v27 = vld [vmem:[%s5104_s6 + $0x10] sm:$0xff]  ;;  %3313 = vmatprep.subr.mxu0 %v3911_v3 }
0x14bb   :  { %3314 = vmatpush3.msra.mxu0 %v2870_v27 }
0x14bc   :  { %3315 = vmatprep.subr.mxu0 %v3911_v3 }
0x14bd   :  { %3316 = vmatpush3.msra.mxu0 %v2869_v21 }
0x14be   :  { %3317 = vmatprep.subr.mxu0 %v3911_v3 }
0x151f   :  { %v2789_v39 = vpop.permute.xlu1 %2788 }
0x1520   :  { %v5008_v4 = vadd.f32 %v2789_v39, %v2732_v31  ;;  %v2791_v23 = vpop.permute.xlu0 %2790  ;;  %v2868_v31 = vld [vmem:[%s5104_s6] sm:$0xff]  ;;  %s3916_s6 = smov [#allocation4]  }
0x1521   :  { %v2813_v48 = vadd.f32 %v2791_v23, %v2733_v43  ;;  %3318 = vmatpush3.msra.mxu0 %v2868_v31  ;;  %s3044_s20 = sshll.u32 %s3916_s6, 4  ;;  %s3045_s20 = int_to_ptr.vmem [resolvable:$true] %s3044_s20 }
0x1522   :  { %3826 = vtanh.f32 %v5008_v4  ;;  %s3847_s0 = scalar_lea.vmem %s3045_s20, 128  ;;  %p3852_p1 = scmp.lt.s32.totalorder %s3045_s20, %s3045_s20 }
0x1523   :  { %v2793_v42 = vpop.permute.xlu1 %2792  ;;  %3828 = vtanh.f32 %v2813_v48  ;;  %v3007_v12 = vrot.slane %v2813_v48, 7  ;;  %p3848_p0 = scmp.ne.s32.totalorder %s3045_s20, %s3847_s0  ;;  %p3853_p2 = scmp.lt.s32.totalorder %s3847_s0, %s3847_s0 }
0x1524   :  { %v2814_v47 = vadd.f32 %v2793_v42, %v2734_v60  ;;  %v2795_v26 = vpop.permute.xlu0 %2794 }
0x1525   :  { %v2815_v33 = vadd.f32 %v2795_v26, %v2735_v7  ;;  %p3854_p3 = por %p3853_p2, %p3852_p1 }
0x1526   :  { %3830 = vtanh.f32 %v2814_v47  ;;  %v3008_v16 = vrot.slane %v2814_v47, 6 }
0x1527   :  { %v2797_v62 = vpop.permute.xlu1 %2796  ;;  %3832 = vtanh.f32 %v2815_v33  ;;  %v3010_v34 = vrot.slane %v2815_v33, 5  ;;  %p3855_p4 = pnand %p3854_p3, %p3848_p0 }
0x1528   :  { %v3009_v9 = vsel %vm518_vm3, %v3008_v16, %v3007_v12  ;;  %v2816_v29 = vadd.f32 %v2797_v62, %v2736_v8  ;;  %v2799_v44 = vpop.permute.xlu0 %2798 }
0x1529   :  { %v2817_v41 = vadd.f32 %v2799_v44, %v2737_v32  ;;  %v3011_v30 = vsel %vm521_vm4, %v3010_v34, %v3009_v9 }
0x152a   :  { %3834 = vtanh.f32 %v2816_v29  ;;  %v3012_v49 = vrot.slane %v2816_v29, 4 }
0x152b   :  { %v2801_v2 = vpop.permute.xlu1 %2800  ;;  %3836 = vtanh.f32 %v2817_v41  ;;  %v3014_v45 = vrot.slane %v2817_v41, 3 }
0x152c   :  { %v3013_v11 = vsel %vm524_vm5, %v3012_v49, %v3011_v30  ;;  %v2818_v57 = vadd.f32 %v2801_v2, %v2738_v0  ;;  %v2803_v56 = vpop.permute.xlu0 %2802 }
0x152d   :  { %v2819_v20 = vadd.f32 %v2803_v56, %v2739_v10  ;;  %v3015_v38 = vsel %vm527_vm6, %v3014_v45, %v3013_v11 }
0x152e   :  { %3838 = vtanh.f32 %v2818_v57  ;;  %v3016_v25 = vrot.slane %v2818_v57, 2 }
0x152f   :  { %v3827_v36 = vpop.eup %3826  ;;  %3840 = vtanh.f32 %v2819_v20  ;;  %v3018_v63 = vrot.slane %v2819_v20, 1 }
0x1530   :  { %2836 = vrot.lane.b32.xlu1 %v3827_v36, %s3913_s5  ;;  %v3017_v53 = vsel %vm530_vm7, %v3016_v25, %v3015_v38  ;;  %v3829_v18 = vpop.eup %3828 }
0x1531   :  { %2838 = vrot.lane.b32.xlu0 %v3829_v18, %s3913_s5  ;;  %v5033_v61 = vsel %vm533_vm8, %v3018_v63, %v3017_v53 }
0x1533   :  { %v3831_v58 = vpop.eup %3830 }
0x1534   :  { %2840 = vrot.lane.b32.xlu1 %v3831_v58, %s3913_s5  ;;  %v3833_v54 = vpop.eup %3832 }
0x1535   :  { %2842 = vrot.lane.b32.xlu0 %v3833_v54, %s3913_s5 }
0x1537   :  { %v3835_v17 = vpop.eup %3834 }
0x1538   :  { %2844 = vrot.lane.b32.xlu1 %v3835_v17, %s3913_s5  ;;  %v3837_v6 = vpop.eup %3836 }
0x1539   :  { %2846 = vrot.lane.b32.xlu0 %v3837_v6, %s3913_s5 }
0x153b   :  { %v3839_v1 = vpop.eup %3838 }
0x153c   :  { %2848 = vrot.lane.b32.xlu1 %v3839_v1, %s3913_s5  ;;  %v3841_v5 = vpop.eup %3840 }
0x153d   :  { %2850 = vrot.lane.b32.xlu0 %v3841_v5, %s3913_s5 }
0x15a2   :  { %v2837_v39 = vpop.permute.xlu1 %2836 }
0x15a3   :  { %v2860_v35 = vmul.f32 %v4974_v28, %v2837_v39  ;;  %v2839_v46 = vpop.permute.xlu0 %2838 }
0x15a4   :  { %v2861_v43 = vmul.f32 %v4978_v52, %v2839_v46 }
0x15a5   :  { %2989 = vrot.lane.b32.xlu0 %v2860_v35, %s3914_s24  ;;  %v2887_v23 = vrot.slane %v2860_v35, 7 }
0x15a6   :  { %v2841_v60 = vpop.permute.xlu1 %2840  ;;  %v2888_v48 = vrot.slane %v2861_v43, 6  ;;  %v2976_v12 = vrot.slane %v2861_v43, 7 }
0x15a7   :  { %v2862_v22 = vmul.f32 %v4980_v13, %v2841_v60  ;;  %v2843_v42 = vpop.permute.xlu0 %2842 }
0x15a8   :  { %v2889_v28 = vsel %vm518_vm3, %v2888_v48, %v2887_v23  ;;  %v2863_v47 = vmul.f32 %v4985_v55, %v2843_v42 }
0x15a9   :  { %3020 = vrot.lane.b32.xlu0 %v5008_v4, %s3915_s19  ;;  %v2890_v50 = vrot.slane %v2862_v22, 5  ;;  %v2977_v3 = vrot.slane %v2862_v22, 6 }
0x15aa   :  { %v2845_v7 = vpop.permute.xlu1 %2844  ;;  %v2892_v16 = vrot.slane %v2863_v47, 4  ;;  %v2979_v52 = vrot.slane %v2863_v47, 5 }
0x15ab   :  { %v2891_v26 = vsel %vm521_vm4, %v2890_v50, %v2889_v28  ;;  %v2864_v4 = vmul.f32 %v4988_v14, %v2845_v7  ;;  %v2978_v8 = vsel %vm518_vm3, %v2977_v3, %v2976_v12  ;;  %v2847_v15 = vpop.permute.xlu0 %2846 }
0x15ac   :  { %v2865_v62 = vmul.f32 %v4993_v59, %v2847_v15  ;;  %v2893_v40 = vsel %vm524_vm5, %v2892_v16, %v2891_v26  ;;  %v2980_v14 = vsel %vm521_vm4, %v2979_v52, %v2978_v8 }
0x15ad   :  { %v2894_v13 = vrot.slane %v2864_v4, 3  ;;  %v2981_v33 = vrot.slane %v2864_v4, 4 }
0x15ae   :  { %v2849_v9 = vpop.permute.xlu1 %2848  ;;  %v2896_v36 = vrot.slane %v2865_v62, 2  ;;  %v2983_v34 = vrot.slane %v2865_v62, 3 }
0x15af   :  { %v2895_v55 = vsel %vm527_vm6, %v2894_v13, %v2893_v40  ;;  %v2866_v29 = vmul.f32 %v4996_v51, %v2849_v9  ;;  %v2982_v32 = vsel %vm524_vm5, %v2981_v33, %v2980_v14  ;;  %v2851_v44 = vpop.permute.xlu0 %2850 }
0x15b0   :  { %v2867_v24 = vmul.f32 %v5001_v19, %v2851_v44  ;;  %v2897_v59 = vsel %vm530_vm7, %v2896_v36, %v2895_v55  ;;  %v2984_v51 = vsel %vm527_vm6, %v2983_v34, %v2982_v32 }
0x15b1   :  { %v2898_v49 = vrot.slane %v2866_v29, 1  ;;  %v2985_v0 = vrot.slane %v2866_v29, 2 }
0x15b2   :  { %v2987_v30 = vrot.slane %v2867_v24, 1 }
0x15b3   :  { %v2899_v41 = vsel %vm533_vm8, %v2898_v49, %v2897_v59  ;;  %v2986_v11 = vsel %vm530_vm7, %v2985_v0, %v2984_v51 }
0x15b4   :  { %v2900_v2 = vsel %vm536_vm9, %v2867_v24, %v2899_v41  ;;  %v2988_v57 = vsel %vm533_vm8, %v2987_v30, %v2986_v11 }
0x15b5   :  { %2901 = vrot.lane.b32.xlu1 %v2900_v2, %s3914_s24 }
0x15b9   :  { %2991 = vrot.lane.b32.xlu1 %v2988_v57, %s3914_s24 }
0x15bd   :  { %3022 = vrot.lane.b32.xlu1 %v5033_v61, %s3915_s19 }
0x1617   :  { %v2990_v19 = vpop.permute.xlu0 %2989 }
0x1618   :  { %2996 = vst.msk [vmem:[#allocation4 - $0x7] sm:$0x80] %vm2995_vm10, %v2990_v19 }
0x161b   :  { %v3021_v45 = vpop.permute.xlu0 %3020 }
0x161c   :  { %3026 = vst.msk [vmem:[#allocation6 - $0x7] sm:$0x80] %vm2995_vm10, %v3021_v45 }
0x1627   :  { %v2902_v10 = vpop.permute.xlu1 %2901 }
0x1628   :  { %3320 = vmatmul.mubr.msk.f32.vlgmr.msra.gmra.mxu0 %vm187_vm2, %v2902_v10 }
0x162b   :  { %v2992_v56 = vpop.permute.xlu1 %2991 }
0x162c   :  { %2998 = vst.msk [vmem:[#allocation4 + $0x1] sm:$0x7f] %vm2997_vm11, %v2992_v56 }
0x162f   :  { %v3023_v25 = vpop.permute.xlu1 %3022 }
0x1630   :  { %3027 = vst.msk [vmem:[#allocation6 + $0x1] sm:$0x7f] %vm2997_vm11, %v3023_v25 }
0x1631   :  { %3858 = shalt.err (!%p3855_p4)
}
0x1632   :  { %3047 = dma.vmem_to_hbm [thread:$0]  %s3045_s20, 128, %s5107_s9, [#allocation5]  }
0x1633   :  { %s3917_s22 = smov [#allocation6]  }
0x1634   :  { %s3054_s23 = sshll.u32 %s3917_s22, 4  ;;  %s3055_s23 = int_to_ptr.vmem [resolvable:$true] %s3054_s23 }
0x1635   :  { %s3867_s24 = scalar_lea.vmem %s3055_s23, 128  ;;  %p3872_p6 = scmp.lt.s32.totalorder %s3055_s23, %s3055_s23 }
0x1636   :  { %p3868_p5 = scmp.ne.s32.totalorder %s3055_s23, %s3867_s24  ;;  %p3873_p7 = scmp.lt.s32.totalorder %s3867_s24, %s3867_s24 }
0x1638   :  { %p3874_p8 = por %p3873_p7, %p3872_p6 }
0x163a   :  { %p3875_p9 = pnand %p3874_p8, %p3868_p5 }
0x163c   :  { %3878 = shalt.err (!%p3875_p9)
}
0x163d   :  { %3057 = dma.vmem_to_hbm [thread:$0]  %s3055_s23, 128, %s5108_s10, [#allocation5]   ;;  %v3150_v20 = vld [vmem:[%s5105_s7] ss:$0 sm:$0xff] }
0x163e   :  { %s3918_s27 = smov [#allocation2]  }
0x163f   :  { %s3034_s9 = sshll.u32 %s3918_s27, 4  ;;  %s3035_s9 = int_to_ptr.vmem [resolvable:$true] %s3034_s9 }
0x1640   :  { %s3887_s28 = scalar_lea.vmem %s3035_s9, 128  ;;  %p3892_p11 = scmp.lt.s32.totalorder %s3035_s9, %s3035_s9 }
0x1641   :  { %p3888_p10 = scmp.ne.s32.totalorder %s3035_s9, %s3887_s28  ;;  %p3893_p12 = scmp.lt.s32.totalorder %s3887_s28, %s3887_s28 }
0x1643   :  { %p3894_p13 = por %p3893_p12, %p3892_p11 }
0x1645   :  { %p3895_p0 = pnand %p3894_p13, %p3888_p10 }
0x16e8   :  { %v2971_v38 = vpop.f32.mrf.mxu0 }
0x16e9   :  { %v2972_v53 = vadd.f32 %v3150_v20, %v2971_v38 }
0x16ea   :  { %v3321_v63 = vpop.f32.mrf.mxu0 }
0x16eb   :  { %2975 = vst.msk [vmem:[#allocation2] sm:$0xff] %vm51_vm0, %v2972_v53 }
0x16ec   :  { %3898 = shalt.err (!%p3895_p0)
}
0x16ed   :  { %3037 = dma.vmem_to_hbm [thread:$0]  %s3035_s9, 128, %s5106_s8, [#allocation3]  }
0x16ee   :  { %3907 = dma.done.wait [#allocation3], 128  }
0x16ef   :  { %3908 = vsyncadd [#allocation3], 4294967168 }
0x16f0   :  { %3909 = dma.done.wait [#allocation5], 256  }
0x16f1   :  { %3910 = vsyncadd [#allocation5], 4294967040 }
0x16f2   :  { %3067 = vsyncpa [#allocation3], 1 }
0x16f3   :  { %3068 = vsyncpa [#allocation5], 1 }

</bundles_post_ra>
